<compile_context>
chip_gen: v7x
topology: tpu7x:2x2x1
jax: 0.10.0
libtpu: 0.0.40
codegen_flags: <defaults>
</compile_context>

<pallas_src>
import numpy as np

import jax
import jax.numpy as jnp
from jax import lax
from jax.experimental import pallas as pl
from jax.experimental.pallas import tpu as pltpu

LANE = 128
SUBLANE = 8


def _round_up(x, m):
    return (x + m - 1) // m * m


def _chip_vmem_capacity_bytes():
    try:
        return int(pltpu.get_tpu_info().vmem_capacity_bytes)
    except Exception:
        return 64 << 20  # conservative: v7x per-TensorCore capacity


def _pick_batch_tile(B, L0_pad):
    """Fill the MXU M dim (TB*L0_pad ~ 256: one 256-wide v6e/v7x pass, two
    128-wide v5e passes), but keep >= 2 grid steps when the batch allows it so
    dimension_semantics=("parallel",) can shard tiles across v7x's 2 TCs."""
    target_m = 256
    tb = max(SUBLANE, (target_m // max(L0_pad, 1)) // SUBLANE * SUBLANE)
    tb = min(tb, _round_up(B, SUBLANE))
    if B >= 2 * SUBLANE and B <= tb:
        tb = _round_up((B + 1) // 2, SUBLANE)
    return tb


def _make_kernel(*, TB, T_pad, L0_pad, K_max, V_pad, E_pad, C_pad):
    """Build the Pallas kernel body (all sizes static)."""
    n_tok = TB * T_pad

    def kernel(tok_ref,    # [TB*T_pad, 1] int32  (per-tile VMEM block)
               emb_ref,    # [V_pad, E_pad] bf16  (VMEM-resident, constant block)
               wcol_ref,   # [K_max*E_pad, C_pad] bf16 (merged im2col conv weight)
               bias_ref,   # [1, C_pad] f32
               mask_ref,   # [L0_pad, C_pad] f32  additive 0 / -1e30 time-validity mask
               fcw_ref,    # [C_pad, LBL_pad] bf16 (pre-transposed FC weight)
               fcb_ref,    # [1, LBL_pad] f32
               out_ref):   # [TB, LBL_pad] f32
        # ---- embedding gather as a one-hot bf16 MXU matmul (table is VMEM-resident) ----
        tok = tok_ref[...]                                              # [n_tok, 1] int32
        vocab_ids = lax.broadcasted_iota(jnp.int32, (n_tok, V_pad), 1)
        onehot = (tok == vocab_ids).astype(jnp.bfloat16)                # [n_tok, V_pad]
        x = jnp.dot(onehot, emb_ref[...],
                    preferred_element_type=jnp.float32)                 # [n_tok, E_pad] f32
        x = x.astype(jnp.bfloat16).reshape(TB, T_pad, E_pad)

        # ---- all kernel-size branches as one unrolled K_max-step accumulate (no concat) ----
        acc = jnp.zeros((TB * L0_pad, C_pad), jnp.float32)
        for k in range(K_max):                                          # K_max is tiny; unrolled
            xk = x[:, k:k + L0_pad, :].reshape(TB * L0_pad, E_pad)
            acc = acc + jnp.dot(xk, wcol_ref[k * E_pad:(k + 1) * E_pad, :],
                                preferred_element_type=jnp.float32)

        # ---- pre-baked mask (0 valid / -1e30 invalid), max-pool over time ----
        masked = acc.reshape(TB, L0_pad, C_pad) + mask_ref[...]
        pooled = jnp.max(masked, axis=1)                                # [TB, C_pad]

        # Bias is constant over time and ReLU/max commute -> deferred past pooling.
        feat = jnp.maximum(pooled + bias_ref[...], 0.0)                 # [TB, C_pad] f32

        # ---- dropout = identity (eval); final FC with 128-wide padded output ----
        logits = jnp.dot(feat.astype(jnp.bfloat16), fcw_ref[...],
                         preferred_element_type=jnp.float32) + fcb_ref[...]
        out_ref[...] = logits.astype(out_ref.dtype)

    return kernel


def prepare_params(params, kernel_sizes, seq_len):
    """Pad / merge torch-layout params into lane-dense kernel operands (one-time prep)."""
    kernel_sizes = tuple(int(k) for k in kernel_sizes)
    K_min, K_max = min(kernel_sizes), max(kernel_sizes)
    assert seq_len >= K_max, "sequence shorter than the largest conv kernel"

    emb = np.asarray(params["embedding"], np.float32)      # [V, E]
    V, E = emb.shape
    C = params["conv_w"][0].shape[0]                        # kernel_num
    n_k = len(kernel_sizes)
    label = params["fc_w"].shape[0]

    V_pad = _round_up(V, LANE)                              # contraction dim of one-hot gather
    E_pad = _round_up(E, LANE)
    C_pad = _round_up(n_k * C, LANE)
    LBL_pad = _round_up(label, LANE)
    L0 = seq_len - K_min + 1                                # most output positions of any branch
    L0_pad = _round_up(L0, SUBLANE)
    T_pad = _round_up(L0_pad + K_max - 1, SUBLANE)

    # Embedding table: zero-pad to [V_pad, E_pad], bf16 (VMEM-resident matmul operand).
    emb_pad = np.zeros((V_pad, E_pad), np.float32)
    emb_pad[:V, :E] = emb

    # Merged im2col conv weight: branch i occupies channel block [i*C, (i+1)*C);
    # only time offsets k < kernel_sizes[i] are nonzero.
    wcol = np.zeros((K_max * E_pad, C_pad), np.float32)
    bias = np.zeros((1, C_pad), np.float32)
    NEG = np.float32(-1e30)
    mask = np.full((L0_pad, C_pad), NEG, np.float32)        # additive 0 / -1e30 validity mask
    for i, K in enumerate(kernel_sizes):
        w = np.asarray(params["conv_w"][i], np.float32)[:, 0, :, :]   # [C, K, E] torch layout
        w = np.transpose(w, (1, 2, 0))                                # [K, E, C]
        for k in range(K):
            wcol[k * E_pad:k * E_pad + E, i * C:(i + 1) * C] = w[k]
        bias[0, i * C:(i + 1) * C] = np.asarray(params["conv_b"][i], np.float32)
        mask[:seq_len - K + 1, i * C:(i + 1) * C] = 0.0
    mask[:1, n_k * C:] = 0.0                                # padding channels: 1 valid all-zero row

    # FC: pre-transposed, zero-padded, bf16 weight.
    fcw = np.zeros((C_pad, LBL_pad), np.float32)
    fcw[:n_k * C, :label] = np.asarray(params["fc_w"], np.float32).T
    fcb = np.zeros((1, LBL_pad), np.float32)
    fcb[0, :label] = np.asarray(params["fc_b"], np.float32)

    meta = dict(kernel_sizes=kernel_sizes, K_max=K_max, V_pad=V_pad, E_pad=E_pad,
                C_pad=C_pad, LBL_pad=LBL_pad, L0_pad=L0_pad, T_pad=T_pad,
                T=seq_len, label=label)
    prepared = dict(emb=jnp.asarray(emb_pad, jnp.bfloat16),
                    wcol=jnp.asarray(wcol, jnp.bfloat16),
                    bias=jnp.asarray(bias),
                    mask=jnp.asarray(mask),
                    fcw=jnp.asarray(fcw, jnp.bfloat16),
                    fcb=jnp.asarray(fcb))
    return prepared, meta


def cnn_classifier_forward(tokens, prepared, meta, *, batch_tile=None):
    """Run the CNNClassifier forward pass. tokens: int32 [B, T] (0 = padding id)."""
    B, T = tokens.shape
    assert T == meta["T"]
    T_pad, L0_pad, K_max = meta["T_pad"], meta["L0_pad"], meta["K_max"]
    V_pad, E_pad, C_pad, LBL_pad = meta["V_pad"], meta["E_pad"], meta["C_pad"], meta["LBL_pad"]

    if batch_tile is None:
        batch_tile = _pick_batch_tile(B, L0_pad)
    TB = min(_round_up(batch_tile, SUBLANE), _round_up(B, SUBLANE))
    B_pad = _round_up(B, TB)
    grid = (B_pad // TB,)

    # Pad batch/time (padding token id 0); invalid positions are masked in-kernel.
    # Tokens go in as a lane-narrow column so the in-kernel one-hot needs no relayout.
    tok = jnp.zeros((B_pad, T_pad), jnp.int32).at[:B, :T].set(tokens.astype(jnp.int32))
    tok_col = tok.reshape(B_pad * T_pad, 1)

    kernel = _make_kernel(TB=TB, T_pad=T_pad, L0_pad=L0_pad, K_max=K_max,
                          V_pad=V_pad, E_pad=E_pad, C_pad=C_pad)

    # Chip-aware scoped-VMEM budget: resident operands x2 (double-buffering) +
    # intermediates + margin, capped at physical capacity minus headroom.
    def nbytes(a):
        return int(a.size) * a.dtype.itemsize
    operand_bytes = (TB * T_pad * 4 + TB * LBL_pad * 4
                     + sum(nbytes(prepared[k])
                           for k in ("emb", "wcol", "bias", "mask", "fcw", "fcb")))
    interm_bytes = (TB * T_pad * (V_pad * 2 + E_pad * 6)
                    + TB * L0_pad * (K_max * E_pad * 2 + C_pad * 4 * 3))
    vmem_limit = 2 * operand_bytes + interm_bytes + (4 << 20)
    vmem_limit = int(max(8 << 20,
                         min(vmem_limit, _chip_vmem_capacity_bytes() - (16 << 20))))

    out = pl.pallas_call(
        kernel,
        out_shape=jax.ShapeDtypeStruct((B_pad, LBL_pad), jnp.float32),
        grid_spec=pltpu.PrefetchScalarGridSpec(
            num_scalar_prefetch=0,
            grid=grid,
            in_specs=[
                pl.BlockSpec((TB * T_pad, 1), lambda i: (i, 0)),          # tokens (per tile)
                pl.BlockSpec((V_pad, E_pad), lambda i: (0, 0)),           # embedding (resident)
                pl.BlockSpec((K_max * E_pad, C_pad), lambda i: (0, 0)),   # merged conv weight
                pl.BlockSpec((1, C_pad), lambda i: (0, 0)),               # conv bias
                pl.BlockSpec((L0_pad, C_pad), lambda i: (0, 0)),          # additive time mask
                pl.BlockSpec((C_pad, LBL_pad), lambda i: (0, 0)),         # FC weight
                pl.BlockSpec((1, LBL_pad), lambda i: (0, 0)),             # FC bias
            ],
            out_specs=pl.BlockSpec((TB, LBL_pad), lambda i: (i, 0)),
        ),
        compiler_params=pltpu.CompilerParams(
            dimension_semantics=("parallel",),
            vmem_limit_bytes=vmem_limit,
        ),
    )(tok_col, prepared["emb"], prepared["wcol"], prepared["bias"],
      prepared["mask"], prepared["fcw"], prepared["fcb"])

    return out[:B, :meta["label"]]


def init_params(key, vocab_size, nembedding, kernel_num, kernel_sizes, label_size):
    """Deterministic synthetic params in PyTorch layouts."""
    n_k = len(kernel_sizes)
    keys = jax.random.split(key, 2 * n_k + 3)
    params = {}
    emb = jax.random.normal(keys[0], (vocab_size, nembedding), jnp.float32) * 0.1
    # Row 0 is the padding id; zero it (learned-padding-row behaviour).
    params["embedding"] = emb.at[0].set(0.0)
    params["conv_w"] = []
    params["conv_b"] = []
    for i, K in enumerate(kernel_sizes):
        w = jax.random.normal(keys[1 + 2 * i], (kernel_num, 1, K, nembedding),
                              jnp.float32) * 0.1                   # torch Conv2d [C,1,K,E]
        b = jax.random.normal(keys[2 + 2 * i], (kernel_num,), jnp.float32) * 0.1
        params["conv_w"].append(w)
        params["conv_b"].append(b)
    params["fc_w"] = jax.random.normal(keys[-2], (label_size, n_k * kernel_num),
                                       jnp.float32) * 0.1
    params["fc_b"] = jax.random.normal(keys[-1], (label_size,), jnp.float32) * 0.1
    return params


def _reference_forward(tokens, params, kernel_sizes):
    """Pure-JAX f32 reference matching the PyTorch forward (eval mode)."""
    x = params["embedding"][tokens]                              # [B, T, E]
    T = x.shape[1]
    feats = []
    for i, K in enumerate(kernel_sizes):
        w = params["conv_w"][i][:, 0, :, :]                      # [C, K, E]
        outs = [jnp.einsum("bke,cke->bc", x[:, t:t + K, :], w)
                for t in range(T - K + 1)]
        conv = jnp.stack(outs, axis=-1) + params["conv_b"][i][None, :, None]
        conv = jnp.maximum(conv, 0.0)
        feats.append(jnp.max(conv, axis=-1))                     # [B, C]
    feat = jnp.concatenate(feats, axis=1)
    return feat @ params["fc_w"].T + params["fc_b"]


if __name__ == "__main__":
    # Small shapes consistent with the module; grid of 2 batch tiles.
    B, T = 32, 12
    vocab_size = 50
    nembedding = 32
    kernel_num = 8
    kernel_sizes = (2, 3, 4)
    label_size = 4

    key = jax.random.PRNGKey(0)
    k_tok, k_len, k_par = jax.random.split(key, 3)

    params = init_params(k_par, vocab_size, nembedding, kernel_num, kernel_sizes, label_size)
    prepared, meta = prepare_params(params, kernel_sizes, T)

    # Padded token ids (padding id 0, as pad_packed_sequence(padding_value=0) produces).
    lengths = jax.random.randint(k_len, (B,), max(kernel_sizes), T + 1, dtype=jnp.int32)
    tokens = jax.random.randint(k_tok, (B, T), 1, vocab_size, dtype=jnp.int32)
    time_idx = jnp.arange(T)[None, :]
    tokens = jnp.where(time_idx < lengths[:, None], tokens, 0)

    logits = cnn_classifier_forward(tokens, prepared, meta)
    jax.block_until_ready(logits)
    assert logits.shape == (B, label_size)

    # bf16 matmul operands -> loose tolerance vs. the f32 reference.
    ref = _reference_forward(tokens, params, kernel_sizes)
    max_err = float(jnp.max(jnp.abs(logits - ref)))
    assert max_err < 2e-2, f"kernel/reference mismatch: max abs err = {max_err}"

    print("KERNEL_OK")
</pallas_src>

<mosaic_0001>
module attributes {stable_mosaic.version = 11 : i64} {
  func.func @kernel(%arg0: i32, %arg1: memref<384x1xi32, #tpu.memory_space<vmem>>, %arg2: memref<128x128xbf16, #tpu.memory_space<vmem>>, %arg3: memref<512x128xbf16, #tpu.memory_space<vmem>>, %arg4: memref<1x128xf32, #tpu.memory_space<vmem>>, %arg5: memref<16x128xf32, #tpu.memory_space<vmem>>, %arg6: memref<128x128xbf16, #tpu.memory_space<vmem>>, %arg7: memref<1x128xf32, #tpu.memory_space<vmem>>, %arg8: memref<16x128xf32, #tpu.memory_space<vmem>>) attributes {dimension_semantics = [#tpu.dimension_semantics<parallel>], iteration_bounds = array<i64: 2>, scalar_prefetch = 0 : i64, scratch_operands = 0 : i64, tpu.core_type = #tpu.core_type<tc>, window_params = [{transform_indices = @transform_0, window_bounds = array<i64: 384, 1>}, {pipeline_mode = #tpu.pipeline_mode<synchronous>, transform_indices = @transform_1, window_bounds = array<i64: 128, 128>}, {pipeline_mode = #tpu.pipeline_mode<synchronous>, transform_indices = @transform_2, window_bounds = array<i64: 512, 128>}, {pipeline_mode = #tpu.pipeline_mode<synchronous>, transform_indices = @transform_3, window_bounds = array<i64: 1, 128>}, {pipeline_mode = #tpu.pipeline_mode<synchronous>, transform_indices = @transform_4, window_bounds = array<i64: 16, 128>}, {pipeline_mode = #tpu.pipeline_mode<synchronous>, transform_indices = @transform_5, window_bounds = array<i64: 128, 128>}, {pipeline_mode = #tpu.pipeline_mode<synchronous>, transform_indices = @transform_6, window_bounds = array<i64: 1, 128>}, {transform_indices = @transform_7, window_bounds = array<i64: 16, 128>}]} {
    %c0 = arith.constant 0 : index
    %c0_0 = arith.constant 0 : index
    %0 = vector.load %arg1[%c0, %c0_0] : memref<384x1xi32, #tpu.memory_space<vmem>>, vector<384x1xi32>
    %1 = tpu.iota {dimensions = array<i32: 1>} : vector<384x128xi32>
    %2 = vector.broadcast %0 : vector<384x1xi32> to vector<384x128xi32>
    %3 = arith.cmpi eq, %2, %1 : vector<384x128xi32>
    %4 = arith.extui %3 : vector<384x128xi1> to vector<384x128xi32>
    %5 = arith.sitofp %4 : vector<384x128xi32> to vector<384x128xf32>
    %6 = arith.truncf %5 : vector<384x128xf32> to vector<384x128xbf16>
    %c0_1 = arith.constant 0 : index
    %c0_2 = arith.constant 0 : index
    %7 = vector.load %arg2[%c0_1, %c0_2] : memref<128x128xbf16, #tpu.memory_space<vmem>>, vector<128x128xbf16>
    %cst = arith.constant dense<0.000000e+00> : vector<384x128xf32>
    %8 = tpu.matmul %6, %7, %cst {dimension_numbers = #tpu.dot_dimension_numbers<[1], [0], [0], [1], [0, 0, 1, 1], [], []>} : vector<384x128xbf16>, vector<128x128xbf16>, vector<384x128xf32> -> vector<384x128xf32>
    %9 = arith.truncf %8 : vector<384x128xf32> to vector<384x128xbf16>
    %10 = vector.shape_cast %9 : vector<384x128xbf16> to vector<16x24x128xbf16>
    %cst_3 = arith.constant 0.000000e+00 : f32
    %11 = vector.broadcast %cst_3 : f32 to vector<256x128xf32>
    %12 = vector.extract_strided_slice %10 {offsets = [0, 0, 0], sizes = [16, 16, 128], strides = [1, 1, 1]} : vector<16x24x128xbf16> to vector<16x16x128xbf16>
    %13 = vector.shape_cast %12 : vector<16x16x128xbf16> to vector<256x128xbf16>
    %c0_4 = arith.constant 0 : index
    %c0_5 = arith.constant 0 : index
    %14 = vector.load %arg3[%c0_4, %c0_5] : memref<512x128xbf16, #tpu.memory_space<vmem>>, vector<128x128xbf16>
    %cst_6 = arith.constant dense<0.000000e+00> : vector<256x128xf32>
    %15 = tpu.matmul %13, %14, %cst_6 {dimension_numbers = #tpu.dot_dimension_numbers<[1], [0], [0], [1], [0, 0, 1, 1], [], []>} : vector<256x128xbf16>, vector<128x128xbf16>, vector<256x128xf32> -> vector<256x128xf32>
    %16 = arith.addf %11, %15 : vector<256x128xf32>
    %17 = vector.extract_strided_slice %10 {offsets = [0, 1, 0], sizes = [16, 16, 128], strides = [1, 1, 1]} : vector<16x24x128xbf16> to vector<16x16x128xbf16>
    %18 = vector.shape_cast %17 : vector<16x16x128xbf16> to vector<256x128xbf16>
    %c128 = arith.constant 128 : index
    %c0_7 = arith.constant 0 : index
    %19 = vector.load %arg3[%c128, %c0_7] : memref<512x128xbf16, #tpu.memory_space<vmem>>, vector<128x128xbf16>
    %cst_8 = arith.constant dense<0.000000e+00> : vector<256x128xf32>
    %20 = tpu.matmul %18, %19, %cst_8 {dimension_numbers = #tpu.dot_dimension_numbers<[1], [0], [0], [1], [0, 0, 1, 1], [], []>} : vector<256x128xbf16>, vector<128x128xbf16>, vector<256x128xf32> -> vector<256x128xf32>
    %21 = arith.addf %16, %20 : vector<256x128xf32>
    %22 = vector.extract_strided_slice %10 {offsets = [0, 2, 0], sizes = [16, 16, 128], strides = [1, 1, 1]} : vector<16x24x128xbf16> to vector<16x16x128xbf16>
    %23 = vector.shape_cast %22 : vector<16x16x128xbf16> to vector<256x128xbf16>
    %c256 = arith.constant 256 : index
    %c0_9 = arith.constant 0 : index
    %24 = vector.load %arg3[%c256, %c0_9] : memref<512x128xbf16, #tpu.memory_space<vmem>>, vector<128x128xbf16>
    %cst_10 = arith.constant dense<0.000000e+00> : vector<256x128xf32>
    %25 = tpu.matmul %23, %24, %cst_10 {dimension_numbers = #tpu.dot_dimension_numbers<[1], [0], [0], [1], [0, 0, 1, 1], [], []>} : vector<256x128xbf16>, vector<128x128xbf16>, vector<256x128xf32> -> vector<256x128xf32>
    %26 = arith.addf %21, %25 : vector<256x128xf32>
    %27 = vector.extract_strided_slice %10 {offsets = [0, 3, 0], sizes = [16, 16, 128], strides = [1, 1, 1]} : vector<16x24x128xbf16> to vector<16x16x128xbf16>
    %28 = vector.shape_cast %27 : vector<16x16x128xbf16> to vector<256x128xbf16>
    %c384 = arith.constant 384 : index
    %c0_11 = arith.constant 0 : index
    %29 = vector.load %arg3[%c384, %c0_11] : memref<512x128xbf16, #tpu.memory_space<vmem>>, vector<128x128xbf16>
    %cst_12 = arith.constant dense<0.000000e+00> : vector<256x128xf32>
    %30 = tpu.matmul %28, %29, %cst_12 {dimension_numbers = #tpu.dot_dimension_numbers<[1], [0], [0], [1], [0, 0, 1, 1], [], []>} : vector<256x128xbf16>, vector<128x128xbf16>, vector<256x128xf32> -> vector<256x128xf32>
    %31 = arith.addf %26, %30 : vector<256x128xf32>
    %32 = vector.shape_cast %31 : vector<256x128xf32> to vector<16x16x128xf32>
    %c0_13 = arith.constant 0 : index
    %c0_14 = arith.constant 0 : index
    %33 = vector.load %arg5[%c0_13, %c0_14] : memref<16x128xf32, #tpu.memory_space<vmem>>, vector<16x128xf32>
    %34 = vector.shape_cast %33 : vector<16x128xf32> to vector<1x16x128xf32>
    %35 = vector.broadcast %34 : vector<1x16x128xf32> to vector<16x16x128xf32>
    %36 = arith.addf %32, %35 : vector<16x16x128xf32>
    %cst_15 = arith.constant dense<0xFF800000> : vector<16x128xf32>
    %37 = vector.multi_reduction <maximumf>, %36, %cst_15 [1] : vector<16x16x128xf32> to vector<16x128xf32>
    %c0_16 = arith.constant 0 : index
    %c0_17 = arith.constant 0 : index
    %38 = vector.load %arg4[%c0_16, %c0_17] : memref<1x128xf32, #tpu.memory_space<vmem>>, vector<1x128xf32>
    %39 = vector.broadcast %38 : vector<1x128xf32> to vector<16x128xf32>
    %40 = arith.addf %37, %39 : vector<16x128xf32>
    %cst_18 = arith.constant 0.000000e+00 : f32
    %41 = vector.broadcast %cst_18 : f32 to vector<16x128xf32>
    %42 = arith.maximumf %40, %41 : vector<16x128xf32>
    %43 = arith.truncf %42 : vector<16x128xf32> to vector<16x128xbf16>
    %c0_19 = arith.constant 0 : index
    %c0_20 = arith.constant 0 : index
    %44 = vector.load %arg6[%c0_19, %c0_20] : memref<128x128xbf16, #tpu.memory_space<vmem>>, vector<128x128xbf16>
    %cst_21 = arith.constant dense<0.000000e+00> : vector<16x128xf32>
    %45 = tpu.matmul %43, %44, %cst_21 {dimension_numbers = #tpu.dot_dimension_numbers<[1], [0], [0], [1], [0, 0, 1, 1], [], []>} : vector<16x128xbf16>, vector<128x128xbf16>, vector<16x128xf32> -> vector<16x128xf32>
    %c0_22 = arith.constant 0 : index
    %c0_23 = arith.constant 0 : index
    %46 = vector.load %arg7[%c0_22, %c0_23] : memref<1x128xf32, #tpu.memory_space<vmem>>, vector<1x128xf32>
    %47 = vector.broadcast %46 : vector<1x128xf32> to vector<16x128xf32>
    %48 = arith.addf %45, %47 : vector<16x128xf32>
    %c0_24 = arith.constant 0 : index
    %c0_25 = arith.constant 0 : index
    %49 = vector.load %arg8[%c0_24, %c0_25] : memref<16x128xf32, #tpu.memory_space<vmem>>, vector<16x128xf32>
    tpu.vector_store %arg8[%c0_24, %c0_25], %48 {strides = array<i32>} : memref<16x128xf32, #tpu.memory_space<vmem>>, vector<16x128xf32>,
    return
  }
  func.func @transform_0(%arg0: i32) -> (i32, i32) {
    %c0_i32 = arith.constant 0 : i32
    %c0_i32_0 = arith.constant 0 : i32
    return %arg0, %c0_i32 : i32, i32
  }
  func.func @transform_1(%arg0: i32) -> (i32, i32) {
    %c0_i32 = arith.constant 0 : i32
    %c0_i32_0 = arith.constant 0 : i32
    %c0_i32_1 = arith.constant 0 : i32
    return %c0_i32, %c0_i32_0 : i32, i32
  }
  func.func @transform_2(%arg0: i32) -> (i32, i32) {
    %c0_i32 = arith.constant 0 : i32
    %c0_i32_0 = arith.constant 0 : i32
    %c0_i32_1 = arith.constant 0 : i32
    return %c0_i32, %c0_i32_0 : i32, i32
  }
  func.func @transform_3(%arg0: i32) -> (i32, i32) {
    %c0_i32 = arith.constant 0 : i32
    %c0_i32_0 = arith.constant 0 : i32
    %c0_i32_1 = arith.constant 0 : i32
    return %c0_i32, %c0_i32_0 : i32, i32
  }
  func.func @transform_4(%arg0: i32) -> (i32, i32) {
    %c0_i32 = arith.constant 0 : i32
    %c0_i32_0 = arith.constant 0 : i32
    %c0_i32_1 = arith.constant 0 : i32
    return %c0_i32, %c0_i32_0 : i32, i32
  }
  func.func @transform_5(%arg0: i32) -> (i32, i32) {
    %c0_i32 = arith.constant 0 : i32
    %c0_i32_0 = arith.constant 0 : i32
    %c0_i32_1 = arith.constant 0 : i32
    return %c0_i32, %c0_i32_0 : i32, i32
  }
  func.func @transform_6(%arg0: i32) -> (i32, i32) {
    %c0_i32 = arith.constant 0 : i32
    %c0_i32_0 = arith.constant 0 : i32
    %c0_i32_1 = arith.constant 0 : i32
    return %c0_i32, %c0_i32_0 : i32, i32
  }
  func.func @transform_7(%arg0: i32) -> (i32, i32) {
    %c0_i32 = arith.constant 0 : i32
    %c0_i32_0 = arith.constant 0 : i32
    return %arg0, %c0_i32 : i32, i32
  }
}

</mosaic_0001>

<bundles_post_ra>
// kernel: tpu_custom_call.1
= control target key start
LH: loop header
LB: loop body
LE: loop exit
PB: predicated region body
PF: predicated region fallthrough
CT: control target
= control target key end

     0   :  { %12 = vsyncpa [#allocation3], 0  ;;  %s6615_s0 = inlined_call_operand.vmem [shape: s32[768,1], index: 0, kind: input, shape index: {}]   ;;  %s6616_s1 = inlined_call_operand.vmem [shape: bf16[128,128], index: 1, kind: input, shape index: {}]   ;;  %s6617_s2 = inlined_call_operand.vmem [shape: bf16[512,128], index: 2, kind: input, shape index: {}]   ;;  %s6618_s3 = inlined_call_operand.vmem [shape: f32[1,128], index: 3, kind: input, shape index: {}]   ;;  %s6619_s4 = inlined_call_operand.vmem [shape: f32[16,128], index: 4, kind: input, shape index: {}]   ;;  %s6620_s5 = inlined_call_operand.vmem [shape: bf16[128,128], index: 5, kind: input, shape index: {}]   ;;  %s6621_s6 = inlined_call_operand.vmem [shape: f32[1,128], index: 6, kind: input, shape index: {}]   ;;  %s6622_s7 = inlined_call_operand.hbm [shape: f32[32,128], index: 7, kind: output, shape index: {}]  }
   0x1   :  { %14 = vsyncpa [#allocation3 + $0x1], 0  ;;  %s4502_s24 = smov 0   ;;  %s4504_s25 = smov 0  }
   0x2   :  { %s4506_s26 = smov 0   ;;  %s4508_s27 = smov 0  }
   0x3 LB: > { %s4523_s28 = sadd.s32 4294967295, %s4453_s27   ;;  %s3469_s29 = sadd.s32 4294967294, %s4453_s27   ;;  %s4453_s27 = sphi %s4508_s27, %s7021_s27   ;;  %s4449_s26 = sphi %s4506_s26, %s7020_s26   ;;  %s4445_s25 = sphi %s4504_s25, %s7019_s25   ;;  %s4441_s24 = sphi %s4502_s24, %s7018_s24  }
   0x4   : > { %s4527_s30 = sadd.s32 1, %s4453_s27   ;;  %s179_s8 = sadd.s32 1, %s4449_s26 }
   0x5   : > { %s176_s9 = ssub.s32 %s4453_s27, %s4527_s30  ;;  %p189_p0 = scmp.ne.s32.totalorder %s4449_s26, %s4445_s25 }
   0x6   : > { %p177_p1 = scmp.eq.s32.totalorder %s176_s9, 0  ;;  %p190_p2 = scmp.eq.s32.totalorder %s4523_s28, 1 }
   0x7   : > { %p195_p3 = scmp.ne.s32.totalorder %s4445_s25, %s4441_s24  ;;  %p196_p4 = scmp.eq.s32.totalorder %s3469_s29, 1 }
   0x8   : > { %s4538_s10 = scalar_select %p177_p1, %s4449_s26, %s179_s8  }
   0x9   : > { %p4540_p5 = por %p190_p2, %p189_p0  ;;  %p4544_p6 = por %p196_p4, %p195_p3 }
   0xa   : > { %p3472_p7 = scmp.ge.s32.totalorder %s4453_s27, 1  ;;  %p241_p8 = scmp.lt.s32.totalorder %s4453_s27, 3 }
   0xc   : > { %p242_p9 = pnand %p3472_p7, %p241_p8 }
   0xe   : > { %245 = sbr.rel (%p242_p9) target bundleno = 1126 (0x466), region = 48 }
  0x15   : > { %s273_s13 = smul.u32 48, %s4523_s28  ;;  %v4455_v0 = vmov 0   ;;  %v4343_v1 = vld [vmem:[%s6616_s1] sm:$0xff]   ;;  %v4344_v2 = vld [vmem:[%s6616_s1 + $0x8] sm:$0xff]   ;;  %v4345_v3 = vld [vmem:[%s6616_s1 + $0x10] sm:$0xff]   ;;  %v329_v62 = vlaneseq  ;;  %s270_s22 = sand.u32 1, %s4445_s25  }
  0x16   : > { %4342 = vset.pattern.permute.xlu1 %v4455_v0  ;;  %4341 = vset.pattern.permute.xlu0 %v4455_v0  ;;  %v4346_v8 = vld [vmem:[%s6616_s1 + $0x18] sm:$0xff]   ;;  %v4347_v11 = vld [vmem:[%s6616_s1 + $0x20] sm:$0xff]   ;;  %v4348_v14 = vld [vmem:[%s6616_s1 + $0x28] sm:$0xff]   ;;  %s3473_s29 = sshll.u32 %s270_s22, 4  ;;  %s3786_s14 = sshll.u32 %s4523_s28, 8 }
  0x17   : > { %p274_p10 = scmp.lt.s32.totalorder %s273_s13, 95  ;;  %3924 = vmatprep.subr.bf16.mxu0 %v4343_v1  ;;  %v4349_v17 = vld [vmem:[%s6616_s1 + $0x30] sm:$0xff]   ;;  %v4350_v20 = vld [vmem:[%s6616_s1 + $0x38] sm:$0xff]   ;;  %v4351_v57 = vld [vmem:[%s6617_s2] sm:$0xff]   ;;  %s6572_s17 = scalar_lea.hbm %s6622_s7, %s3786_s14 }
  0x18   : > { %3925 = vmatpush3.bf16.msra.mxu0 %v4343_v1  ;;  %v4352_v58 = vld [vmem:[%s6617_s2 + $0x8] sm:$0xff]   ;;  %v4353_v59 = vld [vmem:[%s6617_s2 + $0x40] sm:$0xff]   ;;  %4036 = vmatprep.subr.bf16.mxu1 %v4351_v57  ;;  %v4354_v60 = vld [vmem:[%s6617_s2 + $0x10] sm:$0xff]   ;;  %v4643_v1 = vand.u32 127, %v329_v62  ;;  %s4459_s19 = smov [#allocation2]  }
  0x19   : > { %s7023_s13 = smov (!%p274_p10, %s273_s13), 95  ;;  %3926 = vmatprep.subr.bf16.mxu0 %v4344_v2  ;;  %4037 = vmatpush3.bf16.msra.mxu1 %v4351_v57  ;;  %v4356_v61 = vld [vmem:[%s6617_s2 + $0x18] sm:$0xff]   ;;  %s4395_s20 = sshll.u32 %s4459_s19, 4  ;;  %s4396_s20 = int_to_ptr.vmem [resolvable:$false] %s4395_s20 }
  0x1a   : > { %s3474_s18 = sshll.u32 %s7023_s13, 3  ;;  %4038 = vmatprep.subr.bf16.mxu1 %v4352_v58  ;;  %v4364_v57 = vld [vmem:[%s6617_s2 + $0x38] sm:$0xff]   ;;  %s272_s13 = scalar_lea.vmem [#allocation2], %s3473_s29 }
  0x1b   : > { %s4563_s23 = scalar_lea.vmem %s6615_s0, %s3474_s18  ;;  %s6574_s18 = scalar_lea.sflag [#allocation3], %s270_s22 }
  0x1c   : > { %v283_v4 = vld [vmem:[%s4563_s23 + $0x10] sm:$0xff]  ;;  %v281_v5 = vld [vmem:[%s4563_s23] sm:$0xff]  ;;  %3927 = vmatpush3.bf16.msra.mxu0 %v4344_v2  ;;  %v284_v6 = vld [vmem:[%s4563_s23 + $0x18] sm:$0xff]  ;;  %s4397_s21 = scalar_lea.vmem %s4396_s20, 512 }
  0x1d   : > { %338 = vperm.xlu1 %4342, %v283_v4   ;;  %332 = vperm.xlu0 %4341, %v281_v5   ;;  %v282_v7 = vld [vmem:[%s4563_s23 + $0x8] sm:$0xff]  ;;  %v285_v10 = vld [vmem:[%s4563_s23 + $0x20] sm:$0xff]  ;;  %v288_v12 = vld [vmem:[%s4563_s23 + $0x38] sm:$0xff]  ;;  %v4456_v5 = vmov 1.0|1.0  }
  0x1e   : > { %3928 = vmatprep.subr.bf16.mxu0 %v4345_v3  ;;  %v286_v9 = vld [vmem:[%s4563_s23 + $0x28] sm:$0xff]  ;;  %v287_v13 = vld [vmem:[%s4563_s23 + $0x30] sm:$0xff]  ;;  %v289_v16 = vld [vmem:[%s4563_s23 + $0x40] sm:$0xff]  ;;  %4039 = vmatpush3.bf16.msra.mxu1 %v4352_v58 }
  0x1f   : > { %v290_v15 = vld [vmem:[%s4563_s23 + $0x48] sm:$0xff]  ;;  %v292_v18 = vld [vmem:[%s4563_s23 + $0x58] sm:$0xff]  ;;  %v291_v19 = vld [vmem:[%s4563_s23 + $0x50] sm:$0xff]  ;;  %4040 = vmatprep.subr.bf16.mxu1 %v4354_v60 }
  0x20   : > { %3929 = vmatpush3.bf16.msra.mxu0 %v4345_v3  ;;  %v294_v21 = vld [vmem:[%s4563_s23 + $0x68] sm:$0xff]  ;;  %v293_v22 = vld [vmem:[%s4563_s23 + $0x60] sm:$0xff]  ;;  %v296_v23 = vld [vmem:[%s4563_s23 + $0x78] sm:$0xff] }
  0x21   : > { %341 = vperm.xlu1 %4342, %v284_v6   ;;  %335 = vperm.xlu0 %4341, %v282_v7   ;;  %v295_v24 = vld [vmem:[%s4563_s23 + $0x70] sm:$0xff]  ;;  %v298_v25 = vld [vmem:[%s4563_s23 + $0x88] sm:$0xff]  ;;  %v297_v26 = vld [vmem:[%s4563_s23 + $0x80] sm:$0xff] }
  0x22   : > { %3930 = vmatprep.subr.bf16.mxu0 %v4346_v8  ;;  %v300_v27 = vld [vmem:[%s4563_s23 + $0x98] sm:$0xff]  ;;  %v299_v28 = vld [vmem:[%s4563_s23 + $0x90] sm:$0xff]  ;;  %v302_v29 = vld [vmem:[%s4563_s23 + $0xa8] sm:$0xff]  ;;  %4041 = vmatpush3.bf16.msra.mxu1 %v4354_v60 }
  0x23   : > { %v301_v30 = vld [vmem:[%s4563_s23 + $0xa0] sm:$0xff]  ;;  %v304_v31 = vld [vmem:[%s4563_s23 + $0xb8] sm:$0xff]  ;;  %v303_v32 = vld [vmem:[%s4563_s23 + $0xb0] sm:$0xff]  ;;  %4042 = vmatprep.subr.bf16.mxu1 %v4356_v61 }
  0x24   : > { %3931 = vmatpush3.bf16.msra.mxu0 %v4346_v8  ;;  %v306_v33 = vld [vmem:[%s4563_s23 + $0xc8] sm:$0xff]  ;;  %v305_v34 = vld [vmem:[%s4563_s23 + $0xc0] sm:$0xff]  ;;  %v308_v35 = vld [vmem:[%s4563_s23 + $0xd8] sm:$0xff] }
  0x25   : > { %347 = vperm.xlu1 %4342, %v286_v9   ;;  %344 = vperm.xlu0 %4341, %v285_v10   ;;  %v307_v36 = vld [vmem:[%s4563_s23 + $0xd0] sm:$0xff]  ;;  %v310_v37 = vld [vmem:[%s4563_s23 + $0xe8] sm:$0xff]  ;;  %v309_v38 = vld [vmem:[%s4563_s23 + $0xe0] sm:$0xff] }
  0x26   : > { %3932 = vmatprep.subr.bf16.mxu0 %v4347_v11  ;;  %v312_v39 = vld [vmem:[%s4563_s23 + $0xf8] sm:$0xff]  ;;  %v311_v40 = vld [vmem:[%s4563_s23 + $0xf0] sm:$0xff]  ;;  %v314_v41 = vld [vmem:[%s4563_s23 + $0x108] sm:$0xff]  ;;  %4043 = vmatpush3.bf16.msra.mxu1 %v4356_v61 }
  0x27   : > { %v313_v42 = vld [vmem:[%s4563_s23 + $0x100] sm:$0xff]  ;;  %v316_v43 = vld [vmem:[%s4563_s23 + $0x118] sm:$0xff]  ;;  %v315_v44 = vld [vmem:[%s4563_s23 + $0x110] sm:$0xff] }
  0x28   : > { %3933 = vmatpush3.bf16.msra.mxu0 %v4347_v11  ;;  %v318_v45 = vld [vmem:[%s4563_s23 + $0x128] sm:$0xff]  ;;  %v317_v46 = vld [vmem:[%s4563_s23 + $0x120] sm:$0xff]  ;;  %v320_v47 = vld [vmem:[%s4563_s23 + $0x138] sm:$0xff] }
  0x29   : > { %353 = vperm.xlu1 %4342, %v288_v12   ;;  %350 = vperm.xlu0 %4341, %v287_v13   ;;  %v319_v48 = vld [vmem:[%s4563_s23 + $0x130] sm:$0xff]  ;;  %v322_v49 = vld [vmem:[%s4563_s23 + $0x148] sm:$0xff]  ;;  %v321_v50 = vld [vmem:[%s4563_s23 + $0x140] sm:$0xff] }
  0x2a   : > { %3934 = vmatprep.subr.bf16.mxu0 %v4348_v14  ;;  %v324_v51 = vld [vmem:[%s4563_s23 + $0x158] sm:$0xff]  ;;  %v323_v52 = vld [vmem:[%s4563_s23 + $0x150] sm:$0xff]  ;;  %v326_v53 = vld [vmem:[%s4563_s23 + $0x168] sm:$0xff] }
  0x2b   : > { %v325_v54 = vld [vmem:[%s4563_s23 + $0x160] sm:$0xff]  ;;  %v328_v55 = vld [vmem:[%s4563_s23 + $0x178] sm:$0xff]  ;;  %v327_v56 = vld [vmem:[%s4563_s23 + $0x170] sm:$0xff]  ;;  %s3407_s23 = sshll.u32 %s272_s13, 4  ;;  %s6567_s23 = int_to_ptr.vmem [resolvable:$true] %s3407_s23 }
  0x2c   : > { %3935 = vmatpush3.bf16.msra.mxu0 %v4348_v14  ;;  %v4355_v4 = vld [vmem:[%s6617_s2 + $0x48] sm:$0xff]   ;;  %v4357_v8 = vld [vmem:[%s6617_s2 + $0x50] sm:$0xff]   ;;  %v4753_v60 = vld [vmem:[%s6617_s2 + $0x80] sm:$0xff]   ;;  %s4391_s28 = scalar_lea.vmem %s6567_s23, 256  ;;  %p4398_p0 = scmp.lt.s32.totalorder %s6567_s23, %s4396_s20 }
  0x2d   : > { %359 = vperm.xlu1 %4342, %v290_v15   ;;  %356 = vperm.xlu0 %4341, %v289_v16   ;;  %v4365_v58 = vld [vmem:[%s6617_s2 + $0x70] sm:$0xff]   ;;  %p4392_p11 = scmp.ne.s32.totalorder %s6567_s23, %s4391_s28  ;;  %p4399_p1 = scmp.lt.s32.totalorder %s4397_s21, %s4391_s28 }
  0x2e   : > { %3936 = vmatprep.subr.bf16.mxu0 %v4349_v17 }
  0x2f   : > { %p4393_p12 = pnand %p4392_p11, %p4540_p5  ;;  %p4400_p2 = por %p4399_p1, %p4398_p0 }
  0x30   : > { %3937 = vmatpush3.bf16.msra.mxu0 %v4349_v17 }
  0x31   : > { %365 = vperm.xlu1 %4342, %v292_v18   ;;  %362 = vperm.xlu0 %4341, %v291_v19   ;;  %p4394_p13 = pneg %p4393_p12 }
  0x32   : > { %3938 = vmatprep.subr.bf16.mxu0 %v4350_v20 }
  0x33   : > { %p4401_p3 = pnand %p4400_p2, %p4394_p13 }
  0x34   : > { %3939 = vmatpush3.bf16.msra.mxu0 %v4350_v20 }
  0x35   : > { %371 = vperm.xlu1 %4342, %v294_v21   ;;  %368 = vperm.xlu0 %4341, %v293_v22  }
  0x36   : > { %3988 = vmatprep.subr.bf16.mxu0 %v4353_v59 }
  0x39   : > { %377 = vperm.xlu1 %4342, %v296_v23   ;;  %374 = vperm.xlu0 %4341, %v295_v24  }
  0x3d   : > { %383 = vperm.xlu1 %4342, %v298_v25   ;;  %380 = vperm.xlu0 %4341, %v297_v26  }
  0x41   : > { %389 = vperm.xlu1 %4342, %v300_v27   ;;  %386 = vperm.xlu0 %4341, %v299_v28  }
  0x45   : > { %395 = vperm.xlu1 %4342, %v302_v29   ;;  %392 = vperm.xlu0 %4341, %v301_v30  }
  0x49   : > { %401 = vperm.xlu1 %4342, %v304_v31   ;;  %398 = vperm.xlu0 %4341, %v303_v32  }
  0x4d   : > { %407 = vperm.xlu1 %4342, %v306_v33   ;;  %404 = vperm.xlu0 %4341, %v305_v34  }
  0x51   : > { %413 = vperm.xlu1 %4342, %v308_v35   ;;  %410 = vperm.xlu0 %4341, %v307_v36  }
  0x55   : > { %419 = vperm.xlu1 %4342, %v310_v37   ;;  %416 = vperm.xlu0 %4341, %v309_v38  }
  0x59   : > { %425 = vperm.xlu1 %4342, %v312_v39   ;;  %422 = vperm.xlu0 %4341, %v311_v40  }
  0x5d   : > { %431 = vperm.xlu1 %4342, %v314_v41   ;;  %428 = vperm.xlu0 %4341, %v313_v42  }
  0x61   : > { %437 = vperm.xlu1 %4342, %v316_v43   ;;  %434 = vperm.xlu0 %4341, %v315_v44  }
  0x65   : > { %443 = vperm.xlu1 %4342, %v318_v45   ;;  %440 = vperm.xlu0 %4341, %v317_v46  }
  0x69   : > { %449 = vperm.xlu1 %4342, %v320_v47   ;;  %446 = vperm.xlu0 %4341, %v319_v48  }
  0x6d   : > { %455 = vperm.xlu1 %4342, %v322_v49   ;;  %452 = vperm.xlu0 %4341, %v321_v50  }
  0x71   : > { %461 = vperm.xlu1 %4342, %v324_v51   ;;  %458 = vperm.xlu0 %4341, %v323_v52   ;;  %v4358_v51 = vld [vmem:[%s6617_s2 + $0x20] sm:$0xff]   ;;  %v4359_v52 = vld [vmem:[%s6617_s2 + $0x58] sm:$0xff]  }
  0x72   : > { %4044 = vmatprep.subr.bf16.mxu1 %v4358_v51 }
  0x73   : > { %4045 = vmatpush3.bf16.msra.mxu1 %v4358_v51 }
  0x75   : > { %467 = vperm.xlu1 %4342, %v326_v53   ;;  %464 = vperm.xlu0 %4341, %v325_v54   ;;  %v4360_v53 = vld [vmem:[%s6617_s2 + $0x28] sm:$0xff]   ;;  %v4361_v54 = vld [vmem:[%s6617_s2 + $0x60] sm:$0xff]  }
  0x76   : > { %4046 = vmatprep.subr.bf16.mxu1 %v4360_v53 }
  0x77   : > { %4047 = vmatpush3.bf16.msra.mxu1 %v4360_v53 }
  0x79   : > { %473 = vperm.xlu1 %4342, %v328_v55   ;;  %470 = vperm.xlu0 %4341, %v327_v56   ;;  %v4362_v55 = vld [vmem:[%s6617_s2 + $0x30] sm:$0xff]   ;;  %v4363_v56 = vld [vmem:[%s6617_s2 + $0x68] sm:$0xff]  }
  0x7a   : > { %4048 = vmatprep.subr.bf16.mxu1 %v4362_v55 }
  0x7b   : > { %4049 = vmatpush3.bf16.msra.mxu1 %v4362_v55 }
  0x7c   : > { %4050 = vmatprep.subr.bf16.mxu1 %v4364_v57 }
  0x7f   : > { %4051 = vmatpush3.bf16.msra.mxu1 %v4364_v57 }
  0x80   : > { %4084 = vmatprep.subr.bf16.mxu1 %v4753_v60 }
  0x9c   : > { %v339_v63 = vpop.permute.xlu1 %338  ;;  %v333_v0 = vpop.permute.xlu0 %332 }
  0x9d   : > { %vm477_vm0 = vcmp.eq.s32.totalorder %v339_v63, %v4643_v1  ;;  %vm475_vm3 = vcmp.eq.s32.totalorder %v333_v0, %v4643_v1 }
  0xa0   : > { %v342_v2 = vpop.permute.xlu1 %341  ;;  %v336_v3 = vpop.permute.xlu0 %335 }
  0xa1   : > { %vm478_vm1 = vcmp.eq.s32.totalorder %v342_v2, %v4643_v1  ;;  %vm476_vm2 = vcmp.eq.s32.totalorder %v336_v3, %v4643_v1 }
  0xa2   : > { %vm3533_vm4 = vmpackc.low %vm478_vm1, %vm477_vm0 }
  0xa3   : > { %vm3531_vm5 = vmpackc.low %vm476_vm2, %vm475_vm3 }
  0xa4   : > { %3940 = vmatprep.mubr.msk.bf16.mxu0 %vm3531_vm5, %v4456_v5  ;;  %v348_v6 = vpop.permute.xlu1 %347  ;;  %v345_v7 = vpop.permute.xlu0 %344 }
  0xa5   : > { %vm480_vm6 = vcmp.eq.s32.totalorder %v348_v6, %v4643_v1  ;;  %3941 = vmatmul.mubr.msk.bf16.vlgmr.msra.gmra.mrb[0].mxu0 %vm3533_vm4, %v4456_v5  ;;  %vm479_vm7 = vcmp.eq.s32.totalorder %v345_v7, %v4643_v1 }
  0xa6   : > { %vm3535_vm8 = vmpackc.low %vm480_vm6, %vm479_vm7  ;;  %3989 = vmatpush3.bf16.msra.mxu0 %v4353_v59  ;;  %v4366_v59 = vld [vmem:[%s6617_s2 + $0x78] sm:$0xff]  }
  0xa7   : > { %3944 = vmatprep.mubr.msk.bf16.mxu0 %vm3535_vm8, %v4456_v5  ;;  %3990 = vmatprep.subr.bf16.mxu0 %v4355_v4 }
  0xa8   : > { %v354_v9 = vpop.permute.xlu1 %353  ;;  %v351_v10 = vpop.permute.xlu0 %350 }
  0xa9   : > { %vm482_vm9 = vcmp.eq.s32.totalorder %v354_v9, %v4643_v1  ;;  %vm481_vm10 = vcmp.eq.s32.totalorder %v351_v10, %v4643_v1 }
  0xaa   : > { %vm3537_vm11 = vmpackc.low %vm482_vm9, %vm481_vm10  ;;  %3991 = vmatpush3.bf16.msra.mxu0 %v4355_v4 }
  0xab   : > { %3992 = vmatprep.subr.bf16.mxu0 %v4357_v8 }
  0xac   : > { %v360_v11 = vpop.permute.xlu1 %359  ;;  %v357_v12 = vpop.permute.xlu0 %356 }
  0xad   : > { %vm484_vm12 = vcmp.eq.s32.totalorder %v360_v11, %v4643_v1  ;;  %3945 = vmatmul.mubr.msk.bf16.gmra.mrb[4].mxu0 %vm3537_vm11, %v4456_v5  ;;  %vm483_vm13 = vcmp.eq.s32.totalorder %v357_v12, %v4643_v1 }
  0xae   : > { %vm3539_vm14 = vmpackc.low %vm484_vm12, %vm483_vm13  ;;  %3993 = vmatpush3.bf16.msra.mxu0 %v4357_v8 }
  0xaf   : > { %3948 = vmatprep.mubr.msk.bf16.mxu0 %vm3539_vm14, %v4456_v5  ;;  %3994 = vmatprep.subr.bf16.mxu0 %v4359_v52 }
  0xb0   : > { %v366_v13 = vpop.permute.xlu1 %365  ;;  %v363_v14 = vpop.permute.xlu0 %362 }
  0xb1   : > { %vm486_vm15 = vcmp.eq.s32.totalorder %v366_v13, %v4643_v1  ;;  %vm485_vm0 = vcmp.eq.s32.totalorder %v363_v14, %v4643_v1 }
  0xb2   : > { %vm3541_vm1 = vmpackc.low %vm486_vm15, %vm485_vm0  ;;  %3995 = vmatpush3.bf16.msra.mxu0 %v4359_v52 }
  0xb3   : > { %3996 = vmatprep.subr.bf16.mxu0 %v4361_v54 }
  0xb4   : > { %v372_v15 = vpop.permute.xlu1 %371  ;;  %v369_v16 = vpop.permute.xlu0 %368 }
  0xb5   : > { %vm488_vm2 = vcmp.eq.s32.totalorder %v372_v15, %v4643_v1  ;;  %3949 = vmatmul.mubr.msk.bf16.gmra.mrb[8].mxu0 %vm3541_vm1, %v4456_v5  ;;  %vm487_vm3 = vcmp.eq.s32.totalorder %v369_v16, %v4643_v1 }
  0xb6   : > { %vm3543_vm4 = vmpackc.low %vm488_vm2, %vm487_vm3  ;;  %3997 = vmatpush3.bf16.msra.mxu0 %v4361_v54 }
  0xb7   : > { %3952 = vmatprep.mubr.msk.bf16.mxu0 %vm3543_vm4, %v4456_v5  ;;  %3998 = vmatprep.subr.bf16.mxu0 %v4363_v56 }
  0xb8   : > { %v378_v17 = vpop.permute.xlu1 %377  ;;  %v375_v18 = vpop.permute.xlu0 %374 }
  0xb9   : > { %vm490_vm5 = vcmp.eq.s32.totalorder %v378_v17, %v4643_v1  ;;  %vm489_vm6 = vcmp.eq.s32.totalorder %v375_v18, %v4643_v1 }
  0xba   : > { %vm3545_vm7 = vmpackc.low %vm490_vm5, %vm489_vm6  ;;  %3999 = vmatpush3.bf16.msra.mxu0 %v4363_v56 }
  0xbb   : > { %4000 = vmatprep.subr.bf16.mxu0 %v4365_v58 }
  0xbc   : > { %v384_v19 = vpop.permute.xlu1 %383  ;;  %v381_v20 = vpop.permute.xlu0 %380 }
  0xbd   : > { %vm492_vm8 = vcmp.eq.s32.totalorder %v384_v19, %v4643_v1  ;;  %3953 = vmatmul.mubr.msk.bf16.gmra.mrb[12].mxu0 %vm3545_vm7, %v4456_v5  ;;  %vm491_vm9 = vcmp.eq.s32.totalorder %v381_v20, %v4643_v1 }
  0xbe   : > { %vm3547_vm10 = vmpackc.low %vm492_vm8, %vm491_vm9  ;;  %4001 = vmatpush3.bf16.msra.mxu0 %v4365_v58 }
  0xbf   : > { %3956 = vmatprep.mubr.msk.bf16.mxu0 %vm3547_vm10, %v4456_v5  ;;  %4002 = vmatprep.subr.bf16.mxu0 %v4366_v59 }
  0xc0   : > { %v390_v21 = vpop.permute.xlu1 %389  ;;  %v387_v22 = vpop.permute.xlu0 %386 }
  0xc1   : > { %vm494_vm11 = vcmp.eq.s32.totalorder %v390_v21, %v4643_v1  ;;  %vm493_vm12 = vcmp.eq.s32.totalorder %v387_v22, %v4643_v1 }
  0xc2   : > { %vm3549_vm13 = vmpackc.low %vm494_vm11, %vm493_vm12  ;;  %4003 = vmatpush3.bf16.msra.mxu0 %v4366_v59 }
  0xc4   : > { %v396_v23 = vpop.permute.xlu1 %395  ;;  %v393_v24 = vpop.permute.xlu0 %392 }
  0xc5   : > { %vm496_vm14 = vcmp.eq.s32.totalorder %v396_v23, %v4643_v1  ;;  %3957 = vmatmul.mubr.msk.bf16.gmra.mrb[16].mxu0 %vm3549_vm13, %v4456_v5  ;;  %vm495_vm15 = vcmp.eq.s32.totalorder %v393_v24, %v4643_v1 }
  0xc6   : > { %vm3551_vm0 = vmpackc.low %vm496_vm14, %vm495_vm15 }
  0xc7   : > { %3960 = vmatprep.mubr.msk.bf16.mxu0 %vm3551_vm0, %v4456_v5 }
  0xc8   : > { %v402_v25 = vpop.permute.xlu1 %401  ;;  %v399_v26 = vpop.permute.xlu0 %398 }
  0xc9   : > { %vm498_vm1 = vcmp.eq.s32.totalorder %v402_v25, %v4643_v1  ;;  %vm497_vm2 = vcmp.eq.s32.totalorder %v399_v26, %v4643_v1 }
  0xca   : > { %vm3553_vm3 = vmpackc.low %vm498_vm1, %vm497_vm2 }
  0xcc   : > { %v408_v27 = vpop.permute.xlu1 %407  ;;  %v405_v28 = vpop.permute.xlu0 %404 }
  0xcd   : > { %vm500_vm4 = vcmp.eq.s32.totalorder %v408_v27, %v4643_v1  ;;  %3961 = vmatmul.mubr.msk.bf16.gmra.mrb[20].mxu0 %vm3553_vm3, %v4456_v5  ;;  %vm499_vm5 = vcmp.eq.s32.totalorder %v405_v28, %v4643_v1 }
  0xce   : > { %vm3555_vm6 = vmpackc.low %vm500_vm4, %vm499_vm5 }
  0xcf   : > { %3964 = vmatprep.mubr.msk.bf16.mxu0 %vm3555_vm6, %v4456_v5 }
  0xd0   : > { %v414_v29 = vpop.permute.xlu1 %413  ;;  %v411_v30 = vpop.permute.xlu0 %410 }
  0xd1   : > { %vm502_vm7 = vcmp.eq.s32.totalorder %v414_v29, %v4643_v1  ;;  %vm501_vm8 = vcmp.eq.s32.totalorder %v411_v30, %v4643_v1 }
  0xd2   : > { %vm3557_vm9 = vmpackc.low %vm502_vm7, %vm501_vm8 }
  0xd4   : > { %v420_v31 = vpop.permute.xlu1 %419  ;;  %v417_v32 = vpop.permute.xlu0 %416 }
  0xd5   : > { %vm504_vm10 = vcmp.eq.s32.totalorder %v420_v31, %v4643_v1  ;;  %3965 = vmatmul.mubr.msk.bf16.gmra.mrb[24].mxu0 %vm3557_vm9, %v4456_v5  ;;  %vm503_vm11 = vcmp.eq.s32.totalorder %v417_v32, %v4643_v1 }
  0xd6   : > { %vm3559_vm12 = vmpackc.low %vm504_vm10, %vm503_vm11 }
  0xd7   : > { %3968 = vmatprep.mubr.msk.bf16.mxu0 %vm3559_vm12, %v4456_v5 }
  0xd8   : > { %v426_v33 = vpop.permute.xlu1 %425  ;;  %v423_v34 = vpop.permute.xlu0 %422 }
  0xd9   : > { %vm506_vm13 = vcmp.eq.s32.totalorder %v426_v33, %v4643_v1  ;;  %vm505_vm14 = vcmp.eq.s32.totalorder %v423_v34, %v4643_v1 }
  0xda   : > { %vm3561_vm15 = vmpackc.low %vm506_vm13, %vm505_vm14 }
  0xdc   : > { %v432_v35 = vpop.permute.xlu1 %431  ;;  %v429_v36 = vpop.permute.xlu0 %428 }
  0xdd   : > { %vm508_vm0 = vcmp.eq.s32.totalorder %v432_v35, %v4643_v1  ;;  %3969 = vmatmul.mubr.msk.bf16.gmra.mrb[28].mxu0 %vm3561_vm15, %v4456_v5  ;;  %vm507_vm1 = vcmp.eq.s32.totalorder %v429_v36, %v4643_v1 }
  0xde   : > { %vm3563_vm2 = vmpackc.low %vm508_vm0, %vm507_vm1 }
  0xdf   : > { %3972 = vmatprep.mubr.msk.bf16.mxu0 %vm3563_vm2, %v4456_v5 }
  0xe0   : > { %v438_v37 = vpop.permute.xlu1 %437  ;;  %v435_v38 = vpop.permute.xlu0 %434 }
  0xe1   : > { %vm510_vm3 = vcmp.eq.s32.totalorder %v438_v37, %v4643_v1  ;;  %vm509_vm4 = vcmp.eq.s32.totalorder %v435_v38, %v4643_v1 }
  0xe2   : > { %vm3565_vm5 = vmpackc.low %vm510_vm3, %vm509_vm4 }
  0xe4   : > { %v444_v39 = vpop.permute.xlu1 %443  ;;  %v441_v40 = vpop.permute.xlu0 %440 }
  0xe5   : > { %vm512_vm6 = vcmp.eq.s32.totalorder %v444_v39, %v4643_v1  ;;  %3973 = vmatmul.mubr.msk.bf16.gmra.mrb[32].mxu0 %vm3565_vm5, %v4456_v5  ;;  %vm511_vm7 = vcmp.eq.s32.totalorder %v441_v40, %v4643_v1 }
  0xe6   : > { %vm3567_vm8 = vmpackc.low %vm512_vm6, %vm511_vm7 }
  0xe7   : > { %3976 = vmatprep.mubr.msk.bf16.mxu0 %vm3567_vm8, %v4456_v5  ;;  %vm2009_vm8 = vcmask 1042432  }
  0xe8   : > { %v450_v41 = vpop.permute.xlu1 %449  ;;  %v447_v42 = vpop.permute.xlu0 %446 }
  0xe9   : > { %vm514_vm9 = vcmp.eq.s32.totalorder %v450_v41, %v4643_v1  ;;  %vm513_vm10 = vcmp.eq.s32.totalorder %v447_v42, %v4643_v1 }
  0xea   : > { %vm3569_vm11 = vmpackc.low %vm514_vm9, %vm513_vm10  ;;  %vm2010_vm9 = vcmask 1046532   ;;  %vm1092_vm10 = vsmask.f32 3328 }
  0xec   : > { %v456_v43 = vpop.permute.xlu1 %455  ;;  %v453_v44 = vpop.permute.xlu0 %452 }
  0xed   : > { %vm516_vm12 = vcmp.eq.s32.totalorder %v456_v43, %v4643_v1  ;;  %3977 = vmatmul.mubr.msk.bf16.gmra.mrb[36].mxu0 %vm3569_vm11, %v4456_v5  ;;  %vm515_vm13 = vcmp.eq.s32.totalorder %v453_v44, %v4643_v1  ;;  %vm1093_vm11 = vsmask.f32 7440 }
  0xee   : > { %vm3571_vm14 = vmpackc.low %vm516_vm12, %vm515_vm13 }
  0xef   : > { %3980 = vmatprep.mubr.msk.bf16.mxu0 %vm3571_vm14, %v4456_v5  ;;  %vm4845_vm12 = vmor %vm2009_vm8, %vm2010_vm9  ;;  %vm2445_vm14 = vsmask.f32 2304  ;;  %vm3284_vm8 = vcmask 1047559  }
  0xf0   : > { %v462_v45 = vpop.permute.xlu1 %461  ;;  %v459_v46 = vpop.permute.xlu0 %458  ;;  %vm4855_vm13 = vmor %vm1092_vm10, %vm1093_vm11 }
  0xf1   : > { %vm518_vm15 = vcmp.eq.s32.totalorder %v462_v45, %v4643_v1  ;;  %vm517_vm0 = vcmp.eq.s32.totalorder %v459_v46, %v4643_v1 }
  0xf2   : > { %vm3573_vm1 = vmpackc.low %vm518_vm15, %vm517_vm0  ;;  %vm2446_vm15 = vsmask.f32 6416 }
  0xf3   : > { %vm6106_vm0 = vmor %vm2445_vm14, %vm2446_vm15 }
  0xf4   : > { %v468_v47 = vpop.permute.xlu1 %467  ;;  %v465_v48 = vpop.permute.xlu0 %464 }
  0xf5   : > { %vm520_vm2 = vcmp.eq.s32.totalorder %v468_v47, %v4643_v1  ;;  %3981 = vmatmul.mubr.msk.bf16.gmra.mrb[40].mxu0 %vm3573_vm1, %v4456_v5  ;;  %vm519_vm3 = vcmp.eq.s32.totalorder %v465_v48, %v4643_v1  ;;  %vm4458_vm1 = vmmov 0  }
  0xf6   : > { %vm3575_vm4 = vmpackc.low %vm520_vm2, %vm519_vm3  ;;  %vm3266_vm2 = vcmask 1041409   ;;  %vm3269_vm3 = vcmask 1042434  }
  0xf7   : > { %3984 = vmatprep.mubr.msk.bf16.mxu0 %vm3575_vm4, %v4456_v5  ;;  %vm3272_vm4 = vcmask 1043459  }
  0xf8   : > { %v474_v49 = vpop.permute.xlu1 %473  ;;  %v471_v50 = vpop.permute.xlu0 %470 }
  0xf9   : > { %vm522_vm5 = vcmp.eq.s32.totalorder %v474_v49, %v4643_v1  ;;  %vm521_vm6 = vcmp.eq.s32.totalorder %v471_v50, %v4643_v1 }
  0xfa   : > { %vm3577_vm7 = vmpackc.low %vm522_vm5, %vm521_vm6  ;;  %vm3275_vm5 = vcmask 1044484   ;;  %vm3278_vm6 = vcmask 1045509  }
  0xfd   : > { %3985 = vmatmul.mubr.msk.bf16.gmra.mrb[44].mxu0 %vm3577_vm7, %v4456_v5  ;;  %vm3281_vm7 = vcmask 1046534  }
 0x178   : > { %v3942_v61 = vpop.f32.mrb[0].mxu0 }
 0x179   : > { %v4756_v62 = vpack.c.bf16 %v3942_v61, %v3942_v61  ;;  %v741_v63 = vpop.f32.mrb[1].mxu0 }
 0x17a   : > { %v4758_v0 = vpack.c.bf16 %v741_v63, %v741_v63  ;;  %v3943_v1 = vpop.f32.mrb[2].mxu0 }
 0x17b   : > { %v1115_v2 = vshll.u32 %v4756_v62, 16  ;;  %v2457_v3 = vshrl.u32 %v4756_v62, 16  ;;  %v933_v4 = vpack.c.bf16 %v3943_v1, %v3942_v61  ;;  %v744_v5 = vpop.f32.mrb[3].mxu0  ;;  %v4764_v8 = vpack.c.bf16 %v3943_v1, %v3943_v1 }
 0x17c   : > { %v1096_v6 = vshrl.u32 %v4758_v0, 16  ;;  %v1099_v7 = vshll.u32 %v4758_v0, 16  ;;  %v4789_v23 = vpack.c.bf16 %v744_v5, %v744_v5  ;;  %v932_v24 = vpack.c.bf16 %v744_v5, %v741_v63 }
 0x17d   : > { %v4767_v10 = vrot.slane %v2457_v3, 5  ;;  %v4769_v11 = vrot.slane %v1115_v2, 6  ;;  %v4772_v13 = vrot.slane %v1115_v2, 5  ;;  %v4778_v16 = vunpack.c.h.b16 %v933_v4 }
 0x17e   : > { %v4774_v14 = vrot.slane %v1096_v6, 4  ;;  %v4776_v15 = vrot.slane %v1099_v7, 5  ;;  %v4782_v18 = vrot.slane %v1096_v6, 5  ;;  %v1120_v19 = vshrl.u32 %v4764_v8, 16  ;;  %4052 = vmatprep.mubr.bf16.mxu1 %v932_v24 }
 0x17f   : > { %6691 = vst [vmem:[#allocation5_spill] sm:$0xff] %v4767_v10  ;;  %6692 = vst [vmem:[#allocation6_spill] sm:$0xff] %v4769_v11  ;;  %v1123_v20 = vshll.u32 %v4764_v8, 16  ;;  %v4786_v21 = vrot.slane %v1099_v7, 6  ;;  %v3660_v22 = vrot.slane %v4764_v8, 9  ;;  %v1105_v31 = vshll.u32 %v4789_v23, 16 }
 0x180   : > { %6693 = vst [vmem:[#allocation7_spill] sm:$0xff] %v4782_v18  ;;  %v4791_v25 = vpop.f32.mrb[4].mxu0  ;;  %v1122_v26 = vrot.slane %v1120_v19, 4  ;;  %v2463_v28 = vrot.slane %v1120_v19, 5  ;;  %v1109_v32 = vshrl.u32 %v4789_v23, 16  ;;  %v6624_v33 = vrot.slane %v4789_v23, 5 }
 0x181   : > { %6694 = vst [vmem:[#allocation8_spill] sm:$0xff] %v4786_v21  ;;  %v1125_v27 = vrot.slane %v1123_v20, 5  ;;  %v2464_v29 = vrot.slane %v1123_v20, 6  ;;  %v4793_v30 = vpop.f32.mrb[5].mxu0  ;;  %v4800_v34 = vpack.c.bf16 %v4791_v25, %v4791_v25  ;;  %v4810_v41 = vrot.slane %v1105_v31, 5 }
 0x182   : > { %v4802_v35 = vpop.f32.mrb[6].mxu0  ;;  %v3742_v38 = vpack.c.bf16 %v4793_v30, %v4793_v30  ;;  %v4812_v42 = vrot.slane %v1109_v32, 4  ;;  %v4816_v43 = vrot.slane %v6624_v33, 4  ;;  %v1102_v44 = vor.u32 %v4776_v15, %v4774_v14 }
 0x183   : > { %v1126_v36 = vor.u32 %v1125_v27, %v1122_v26  ;;  %v2465_v37 = vor.u32 %v2464_v29, %v2463_v28  ;;  %v4808_v40 = vpop.f32.mrb[7].mxu0  ;;  %v4824_v47 = vrot.slane %v1109_v32, 5  ;;  %v1144_v48 = vshrl.u32 %v4800_v34, 16 }
 0x184   : > { %v4827_v49 = vrot.slane %v1105_v31, 6  ;;  %v1147_v50 = vshll.u32 %v4800_v34, 16  ;;  %v1129_v51 = vshll.u32 %v3742_v38, 16  ;;  %v1133_v52 = vshrl.u32 %v3742_v38, 16 }
 0x185   : > { %v4820_v45 = vrot.slane %v1126_v36, 4  ;;  %v4822_v46 = vrot.slane %v2465_v37, 4  ;;  %6696 = vst [vmem:[#allocation10_spill] sm:$0xff] %v4824_v47  ;;  %v4830_v53 = vrot.slane %v1144_v48, 4  ;;  %v2021_v55 = vrot.slane %v3742_v38, 5 }
 0x186   : > { %6697 = vst [vmem:[#allocation11_spill] sm:$0xff] %v4827_v49  ;;  %v4835_v56 = vpack.c.bf16 %v4802_v35, %v4802_v35  ;;  %v4837_v57 = vrot.slane %v1147_v50, 5  ;;  %v4839_v58 = vrot.slane %v1144_v48, 5  ;;  %v4841_v59 = vrot.slane %v1129_v51, 5 }
 0x187   : > { %6695 = vst [vmem:[#allocation9_spill] sm:$0xff] %v4822_v46  ;;  %v1135_v61 = vrot.slane %v1133_v52, 4  ;;  %v4851_v2 = vrot.slane %v1147_v50, 6  ;;  %v4861_v4 = vsel %vm4845_vm12, %v3660_v22, %v2021_v55  ;;  %v2467_v5 = vrot.slane %v1133_v52, 5 }
 0x188   : > { %6698 = vst [vmem:[#allocation12_spill] sm:$0xff] %v4839_v58  ;;  %v4849_v1 = vpop.f32.mrb[8].mxu0  ;;  %6704 = vst [vmem:[#allocation14_spill] sm:$0xff] %v4861_v4  ;;  %v2468_v6 = vrot.slane %v1129_v51, 6  ;;  %v1153_v15 = vshll.u32 %v4835_v56, 16  ;;  %v1157_v19 = vshrl.u32 %v4835_v56, 16  ;;  %v934_v26 = vpack.c.bf16 %v4808_v40, %v4793_v30 }
 0x189   : > { %6701 = vst [vmem:[#allocation13_spill] sm:$0xff] %v4851_v2  ;;  %v4863_v7 = vpop.f32.mrb[9].mxu0  ;;  %v1136_v14 = vor.u32 %v1135_v61, %v4841_v59  ;;  %v6623_v22 = vrot.slane %v4835_v56, 5  ;;  %v3743_v27 = vpack.c.bf16 %v4808_v40, %v4808_v40  ;;  %v2023_v31 = vrot.slane %v2021_v55, 4 }
 0x18a   : > { %v3951_v20 = vpop.f32.mrb[10].mxu0  ;;  %v4872_v24 = vor.u32 %v2468_v6, %v2467_v5  ;;  %v4881_v32 = vrot.slane %v1153_v15, 5  ;;  %v4883_v36 = vrot.slane %v1157_v19, 4  ;;  %v4890_v48 = vrot.slane %v1157_v19, 5 }
 0x18b   : > { %v776_v28 = vpop.f32.mrb[11].mxu0  ;;  %v4879_v29 = vrot.slane %v1136_v14, 4  ;;  %v4888_v38 = vrot.slane %v6623_v22, 4  ;;  %v4892_v30 = vrot.slane %v1153_v15, 6  ;;  %v1139_v50 = vshll.u32 %v3743_v27, 16 }
 0x18c   : > { %6705 = vst [vmem:[#allocation15_spill] sm:$0xff] %v4872_v24  ;;  %6706 = vst [vmem:[#allocation16_spill] sm:$0xff] %v4890_v48  ;;  %v2024_v40 = vrot.slane %v3743_v27, 5  ;;  %v2472_v51 = vshrl.u32 %v3743_v27, 16  ;;  %v4896_v52 = vpack.c.bf16 %v4849_v1, %v4849_v1  ;;  %v4900_v55 = vpack.c.bf16 %v4863_v7, %v4863_v7  ;;  %v6911_v63 = vld [vmem:[#allocation10_spill] sm:$0xff] }
 0x18d   : > { %6707 = vst [vmem:[#allocation17_spill] sm:$0xff] %v4892_v30  ;;  %v1103_v61 = vrot.slane %v1102_v44, 4  ;;  %v1112_v5 = vor.u32 %v4812_v42, %v4810_v41  ;;  %v937_v6 = vpack.c.bf16 %v3951_v20, %v4849_v1  ;;  %v1141_v14 = vrot.slane %v1139_v50, 5 }
 0x18e   : > { %v4907_v15 = vsel %vm4845_vm12, %v2023_v31, %v2024_v40  ;;  %v4909_v19 = vrot.slane %v2472_v51, 5  ;;  %v4911_v27 = vrot.slane %v1139_v50, 6  ;;  %v1177_v44 = vshll.u32 %v4896_v52, 16 }
 0x18f   : > { %6708 = vst [vmem:[#allocation18_spill] sm:$0xff] %v4907_v15  ;;  %v1181_v42 = vshrl.u32 %v4896_v52, 16  ;;  %v6626_v1 = vrot.slane %v4896_v52, 5  ;;  %v984_v22 = vunpack.c.l.b16 %v934_v26  ;;  %v1142_v31 = vsel %vm4855_vm13, %v4879_v29, %v1141_v14 }
 0x190   : > { %6709 = vst [vmem:[#allocation19_spill] sm:$0xff] %v4909_v19  ;;  %6710 = vst [vmem:[#allocation20_spill] sm:$0xff] %v4911_v27  ;;  %v4913_v17 = vpop.f32.mrb[12].mxu0  ;;  %v1163_v40 = vshll.u32 %v4900_v55, 16  ;;  %v4930_v37 = vrot.slane %v1177_v44, 5  ;;  %v4943_v14 = vrot.slane %v1177_v44, 6  ;;  %v1108_v10 = vsel %vm4855_vm13, %v1103_v61, %v4810_v41 }
 0x191   : > { %v4920_v54 = vpop.f32.mrb[13].mxu0  ;;  %v4932_v9 = vrot.slane %v1181_v42, 4  ;;  %v4936_v12 = vrot.slane %v6626_v1, 4  ;;  %v4941_v29 = vrot.slane %v1181_v42, 5  ;;  %v2487_v50 = vshrl.u32 %v4900_v55, 16 }
 0x192   : > { %v4928_v51 = vpop.f32.mrb[14].mxu0  ;;  %6713 = vst [vmem:[#allocation23_spill] sm:$0xff] %v4943_v14  ;;  %v4946_v8 = vrot.slane %v1163_v40, 6  ;;  %v4948_v39 = vrot.slane %v1163_v40, 5  ;;  %v1113_v1 = vrot.slane %v1112_v5, 4  ;;  %v4953_v11 = vpack.c.bf16 %v3951_v20, %v3951_v20  ;;  %v4368_v40 = vld [vmem:[%s6617_s2 + $0x88] sm:$0xff]  }
 0x193   : > { %6711 = vst [vmem:[#allocation21_spill] sm:$0xff] %v4936_v12  ;;  %v4939_v33 = vpop.f32.mrb[15].mxu0  ;;  %6712 = vst [vmem:[#allocation22_spill] sm:$0xff] %v4941_v29  ;;  %v4955_v26 = vrot.slane %v2487_v50, 5  ;;  %v1769_v42 = vpack.c.b16 %v984_v22, %v4778_v16  ;;  %v936_v44 = vpack.c.bf16 %v776_v28, %v4863_v7  ;;  %v4959_v14 = vpack.c.bf16 %v776_v28, %v776_v28 }
 0x194   : > { %6714 = vst [vmem:[#allocation24_spill] sm:$0xff] %v4946_v8  ;;  %6715 = vst [vmem:[#allocation25_spill] sm:$0xff] %v4953_v11  ;;  %v1118_v29 = vsel %vm4855_vm13, %v1113_v1, %v4772_v13  ;;  %v990_v41 = vunpack.c.l.b16 %v937_v6  ;;  %v1187_v20 = vshll.u32 %v4953_v11, 16  ;;  %v2502_v61 = vshrl.u32 %v4953_v11, 16 }
 0x195   : > { %6716 = vst [vmem:[#allocation26_spill] sm:$0xff] %v4955_v26  ;;  %v3627_v22 = vcombine.low %v1108_v10, %v1118_v29  ;;  %4053 = vmatmul.mubr.bf16.vlgmr.msra.gmra.mrb[0].mxu1 %v1769_v42  ;;  %v989_v7 = vunpack.c.h.b16 %v936_v44  ;;  %v1168_v28 = vshrl.u32 %v4959_v14, 16  ;;  %v1171_v6 = vshll.u32 %v4959_v14, 16 }
 0x196   : > { %v4975_v30 = vrot.slane %v2502_v61, 5  ;;  %v4977_v13 = vrot.slane %v1187_v20, 6  ;;  %v6719_v1 = vpack.c.bf16 %v4802_v35, %v4791_v25  ;;  %4085 = vmatpush3.bf16.msra.mxu1 %v4753_v60  ;;  %v4986_v10 = vrot.slane %v1187_v20, 5  ;;  %v4369_v60 = vld [vmem:[%s6617_s2 + $0x90] sm:$0xff]  }
 0x197   : > { %4004 = vmatprep.mubr.bf16.mxu0 %v3627_v22  ;;  %v4988_v29 = vrot.slane %v1168_v28, 4  ;;  %v6720_v44 = vsel %vm4855_vm13, %v4820_v45, %v4841_v59  ;;  %4086 = vmatprep.subr.bf16.mxu1 %v4368_v40  ;;  %v5003_v35 = vrot.slane %v1171_v6, 5  ;;  %v5005_v20 = vrot.slane %v1168_v28, 5 }
 0x198   : > { %v4972_v5 = vpop.f32.mrb[16].mxu0  ;;  %6717 = vst [vmem:[#allocation27_spill] sm:$0xff] %v4975_v30  ;;  %6718 = vst [vmem:[#allocation28_spill] sm:$0xff] %v4977_v13  ;;  %4056 = vmatprep.mubr.bf16.mxu1 %v6719_v1  ;;  %v3628_v61 = vcombine.low %v6720_v44, %v1142_v31  ;;  %v5009_v22 = vpack.c.bf16 %v4913_v17, %v4913_v17  ;;  %v5015_v59 = vpack.c.bf16 %v4920_v54, %v4920_v54 }
 0x199   : > { %v4983_v16 = vpop.f32.mrb[17].mxu0  ;;  %6721 = vst [vmem:[#allocation29_spill] sm:$0xff] %v5005_v20  ;;  %v939_v31 = vpack.c.bf16 %v4928_v51, %v4913_v17  ;;  %v5021_v1 = vpack.c.bf16 %v4928_v51, %v4928_v51  ;;  %v1771_v28 = vpack.c.b16 %v990_v41, %v989_v7  ;;  %v5023_v44 = vrot.slane %v1171_v6, 6  ;;  %v4370_v41 = vld [vmem:[%s6617_s2 + $0x98] sm:$0xff]  }
 0x19a   : > { %v4996_v50 = vpop.f32.mrb[18].mxu0  ;;  %6722 = vst [vmem:[#allocation30_spill] sm:$0xff] %v5009_v22  ;;  %4005 = vmatmul.mubr.bf16.vlgmr.msra.gmra.mrb[48].mxu0 %v3628_v61  ;;  %6723 = vst [vmem:[#allocation31_spill] sm:$0xff] %v5015_v59  ;;  %v1211_v25 = vshll.u32 %v5009_v22, 16  ;;  %v2517_v42 = vshrl.u32 %v5009_v22, 16  ;;  %v938_v61 = vpack.c.bf16 %v4939_v33, %v4920_v54  ;;  %4087 = vmatpush3.bf16.msra.mxu1 %v4368_v40  ;;  %v1192_v13 = vshrl.u32 %v5015_v59, 16 }
 0x19b   : > { %v5011_v45 = vpop.f32.mrb[19].mxu0  ;;  %6724 = vst [vmem:[#allocation32_spill] sm:$0xff] %v5021_v1  ;;  %6725 = vst [vmem:[#allocation33_spill] sm:$0xff] %v5023_v44  ;;  %v1195_v17 = vshll.u32 %v5015_v59, 16  ;;  %4088 = vmatprep.subr.bf16.mxu1 %v4369_v60  ;;  %v5040_v26 = vunpack.c.h.b16 %v939_v31  ;;  %v1216_v54 = vshrl.u32 %v5021_v1, 16  ;;  %v1219_v48 = vshll.u32 %v5021_v1, 16 }
 0x19c   : > { %v5036_v7 = vrot.slane %v2517_v42, 5  ;;  %v5038_v6 = vrot.slane %v1211_v25, 6  ;;  %v5043_v40 = vrot.slane %v1211_v25, 5  ;;  %v5045_v30 = vrot.slane %v1192_v13, 4 }
 0x19d   : > { %v5047_v8 = vrot.slane %v1195_v17, 5  ;;  %v5049_v51 = vrot.slane %v1192_v13, 5  ;;  %4057 = vmatmul.mubr.bf16.gmra.mrb[4].mxu1 %v1771_v28  ;;  %v5055_v20 = vrot.slane %v1195_v17, 6  ;;  %v5057_v31 = vrot.slane %v1216_v54, 4 }
 0x19e   : > { %6726 = vst [vmem:[#allocation34_spill] sm:$0xff] %v5036_v7  ;;  %6727 = vst [vmem:[#allocation35_spill] sm:$0xff] %v5038_v6  ;;  %4060 = vmatprep.mubr.bf16.mxu1 %v938_v61  ;;  %4089 = vmatpush3.bf16.msra.mxu1 %v4369_v60  ;;  %v5065_v13 = vpack.c.bf16 %v4939_v33, %v4939_v33  ;;  %v1150_v28 = vor.u32 %v4837_v57, %v4830_v53  ;;  %v4371_v61 = vld [vmem:[%s6617_s2 + $0xa0] sm:$0xff]   ;;  %v5076_v60 = vrot.slane %v1219_v48, 5 }
 0x19f   : > { %6728 = vst [vmem:[#allocation36_spill] sm:$0xff] %v5049_v51  ;;  %6729 = vst [vmem:[#allocation37_spill] sm:$0xff] %v5055_v20  ;;  %v1160_v17 = vor.u32 %v4883_v36, %v4881_v32  ;;  %4090 = vmatprep.subr.bf16.mxu1 %v4370_v41  ;;  %v5078_v19 = vrot.slane %v1216_v54, 5  ;;  %v5080_v7 = vrot.slane %v1219_v48, 6  ;;  %v5084_v33 = vpack.c.bf16 %v4972_v5, %v4972_v5 }
 0x1a0   : > { %v5051_v44 = vpop.f32.mrb[20].mxu0  ;;  %6730 = vst [vmem:[#allocation38_spill] sm:$0xff] %v5065_v13  ;;  %v1201_v57 = vshll.u32 %v5065_v13, 16  ;;  %v1205_v36 = vshrl.u32 %v5065_v13, 16  ;;  %v6638_v6 = vrot.slane %v5065_v13, 5  ;;  %v1151_v20 = vrot.slane %v1150_v28, 4 }
 0x1a1   : > { %v5060_v25 = vpop.f32.mrb[21].mxu0  ;;  %6731 = vst [vmem:[#allocation39_spill] sm:$0xff] %v5078_v19  ;;  %6732 = vst [vmem:[#allocation40_spill] sm:$0xff] %v5080_v7  ;;  %v1161_v51 = vrot.slane %v1160_v17, 4  ;;  %v1240_v27 = vshrl.u32 %v5084_v33, 16  ;;  %v1243_v54 = vshll.u32 %v5084_v33, 16  ;;  %v5095_v48 = vpack.c.bf16 %v4983_v16, %v4983_v16 }
 0x1a2   : > { %v5071_v42 = vpop.f32.mrb[22].mxu0  ;;  %6733 = vst [vmem:[#allocation41_spill] sm:$0xff] %v5084_v33  ;;  %4091 = vmatpush3.bf16.msra.mxu1 %v4370_v41  ;;  %v5097_v7 = vrot.slane %v1201_v57, 5  ;;  %v5099_v19 = vrot.slane %v1205_v36, 4  ;;  %v5103_v46 = vrot.slane %v6638_v6, 4  ;;  %v5106_v17 = vrot.slane %v1205_v36, 5 }
 0x1a3   : > { %v5086_v53 = vpop.f32.mrb[23].mxu0  ;;  %6734 = vst [vmem:[#allocation42_spill] sm:$0xff] %v5095_v48  ;;  %4092 = vmatprep.subr.bf16.mxu1 %v4371_v61  ;;  %v5108_v24 = vrot.slane %v1201_v57, 6  ;;  %v1156_v2 = vsel %vm4855_vm13, %v1151_v20, %v4881_v32  ;;  %v1166_v41 = vsel %vm4855_vm13, %v1161_v51, %v4948_v39  ;;  %v4372_v6 = vld [vmem:[%s6617_s2 + $0xa8] sm:$0xff]   ;;  %v5119_v49 = vrot.slane %v1240_v27, 4 }
 0x1a4   : > { %6735 = vst [vmem:[#allocation43_spill] sm:$0xff] %v5103_v46  ;;  %6736 = vst [vmem:[#allocation44_spill] sm:$0xff] %v5106_v17  ;;  %v3629_v58 = vcombine.low %v1156_v2, %v1166_v41  ;;  %v5121_v28 = vrot.slane %v1243_v54, 5  ;;  %v5123_v36 = vrot.slane %v1240_v27, 5  ;;  %v1229_v32 = vshrl.u32 %v5095_v48, 16 }
 0x1a5   : > { %6737 = vst [vmem:[#allocation45_spill] sm:$0xff] %v5108_v24  ;;  %v1225_v24 = vshll.u32 %v5095_v48, 16  ;;  %v1174_v39 = vor.u32 %v5003_v35, %v4988_v29  ;;  %v1184_v2 = vor.u32 %v4932_v9, %v4930_v37  ;;  %v5140_v41 = vpack.c.bf16 %v4996_v50, %v4996_v50  ;;  %v4373_v29 = vld [vmem:[%s6617_s2 + $0xb0] sm:$0xff]  }
 0x1a6   : > { %6738 = vst [vmem:[#allocation46_spill] sm:$0xff] %v5123_v36  ;;  %4093 = vmatpush3.bf16.msra.mxu1 %v4371_v61  ;;  %4008 = vmatprep.mubr.bf16.mxu0 %v3629_v58  ;;  %v940_v20 = vpack.c.bf16 %v5011_v45, %v4983_v16  ;;  %v5149_v58 = vrot.slane %v1243_v54, 6  ;;  %v5153_v9 = vrot.slane %v1229_v32, 4  ;;  %v6741_v61 = vrot.slane %v5095_v48, 5 }
 0x1a7   : > { %6739 = vst [vmem:[#allocation47_spill] sm:$0xff] %v5140_v41  ;;  %v5151_v35 = vrot.slane %v1225_v24, 5  ;;  %4094 = vmatprep.subr.bf16.mxu1 %v4372_v6  ;;  %v5161_v16 = vrot.slane %v1229_v32, 5  ;;  %v1175_v47 = vrot.slane %v1174_v39, 4  ;;  %v1185_v21 = vrot.slane %v1184_v2, 4 }
 0x1a8   : > { %v5125_v57 = vpop.f32.mrb[24].mxu0  ;;  %6740 = vst [vmem:[#allocation48_spill] sm:$0xff] %v5149_v58  ;;  %v5157_v27 = vrot.slane %v6741_v61, 4  ;;  %v1249_v18 = vshll.u32 %v5140_v41, 16  ;;  %v5164_v15 = vrot.slane %v1225_v24, 6  ;;  %v1253_v54 = vshrl.u32 %v5140_v41, 16 }
 0x1a9   : > { %v5132_v51 = vpop.f32.mrb[25].mxu0  ;;  %6743 = vst [vmem:[#allocation50_spill] sm:$0xff] %v5161_v16  ;;  %v6641_v58 = vrot.slane %v5140_v41, 5  ;;  %v5170_v4 = vpack.c.bf16 %v5011_v45, %v5011_v45  ;;  %v1180_v32 = vsel %vm4855_vm13, %v1175_v47, %v4930_v37  ;;  %v1190_v39 = vsel %vm4855_vm13, %v1185_v21, %v4986_v10  ;;  %v4374_v47 = vld [vmem:[%s6617_s2 + $0xb8] sm:$0xff]   ;;  %v5231_v41 = vld [vmem:[%s6617_s2 + $0xc0] sm:$0xff]  }
 0x1aa   : > { %v5144_v36 = vpop.f32.mrb[26].mxu0  ;;  %6742 = vst [vmem:[#allocation49_spill] sm:$0xff] %v5157_v27  ;;  %6744 = vst [vmem:[#allocation51_spill] sm:$0xff] %v5164_v15  ;;  %4095 = vmatpush3.bf16.msra.mxu1 %v4372_v6  ;;  %v5178_v2 = vrot.slane %v1249_v18, 5  ;;  %v996_v24 = vunpack.c.l.b16 %v940_v20  ;;  %v3630_v61 = vcombine.low %v1180_v32, %v1190_v39  ;;  %v5180_v15 = vrot.slane %v1253_v54, 4 }
 0x1ab   : > { %v5159_v17 = vpop.f32.mrb[27].mxu0  ;;  %6745 = vst [vmem:[#allocation52_spill] sm:$0xff] %v5170_v4  ;;  %4096 = vmatprep.subr.bf16.mxu1 %v4373_v29  ;;  %v5184_v45 = vrot.slane %v6641_v58, 4  ;;  %v5186_v6 = vrot.slane %v1249_v18, 6  ;;  %v5191_v37 = vrot.slane %v1253_v54, 5  ;;  %v1235_v21 = vshll.u32 %v5170_v4, 16 }
 0x1ac   : > { %v2532_v10 = vshrl.u32 %v5170_v4, 16  ;;  %v5197_v20 = vpack.c.bf16 %v5051_v44, %v5051_v44  ;;  %4009 = vmatmul.mubr.bf16.gmra.mrb[52].mxu0 %v3630_v61  ;;  %v5204_v39 = vpack.c.bf16 %v5060_v25, %v5060_v25  ;;  %v1198_v54 = vor.u32 %v5047_v8, %v5045_v30  ;;  %6753 = vst [vmem:[#allocation60_spill] sm:$0xff] %v5231_v41 }
 0x1ad   : > { %6746 = vst [vmem:[#allocation53_spill] sm:$0xff] %v5184_v45  ;;  %6747 = vst [vmem:[#allocation54_spill] sm:$0xff] %v5186_v6  ;;  %v943_v58 = vpack.c.bf16 %v5071_v42, %v5051_v44  ;;  %v5214_v16 = vrot.slane %v1235_v21, 6  ;;  %v1208_v18 = vor.u32 %v5099_v19, %v5097_v7  ;;  %v5221_v33 = vrot.slane %v1235_v21, 5 }
 0x1ae   : > { %6748 = vst [vmem:[#allocation55_spill] sm:$0xff] %v5191_v37  ;;  %6749 = vst [vmem:[#allocation56_spill] sm:$0xff] %v5197_v20  ;;  %v5212_v37 = vrot.slane %v2532_v10, 5  ;;  %v1273_v61 = vshll.u32 %v5197_v20, 16  ;;  %4097 = vmatpush3.bf16.msra.mxu1 %v4373_v29  ;;  %v1277_v8 = vshrl.u32 %v5197_v20, 16  ;;  %v1259_v44 = vshll.u32 %v5204_v39, 16 }
 0x1af   : > { %6750 = vst [vmem:[#allocation57_spill] sm:$0xff] %v5204_v39  ;;  %6752 = vst [vmem:[#allocation59_spill] sm:$0xff] %v5214_v16  ;;  %4098 = vmatprep.subr.bf16.mxu1 %v4374_v47  ;;  %v2547_v27 = vshrl.u32 %v5204_v39, 16  ;;  %v6754_v4 = vrot.slane %v5197_v20, 5  ;;  %v1199_v19 = vrot.slane %v1198_v54, 4  ;;  %v5257_v16 = vpack.c.bf16 %v5071_v42, %v5071_v42 }
 0x1b0   : > { %v5199_v32 = vpop.f32.mrb[28].mxu0  ;;  %6751 = vst [vmem:[#allocation58_spill] sm:$0xff] %v5212_v37  ;;  %v5235_v29 = vrot.slane %v1273_v61, 5  ;;  %v5239_v30 = vrot.slane %v1277_v8, 4  ;;  %v5245_v48 = vrot.slane %v1277_v8, 5  ;;  %v5247_v46 = vrot.slane %v1273_v61, 6 }
 0x1b1   : > { %v5210_v6 = vpop.f32.mrb[29].mxu0  ;;  %v5243_v1 = vrot.slane %v6754_v4, 4  ;;  %v5249_v22 = vrot.slane %v2547_v27, 5  ;;  %v5251_v59 = vrot.slane %v1259_v44, 6  ;;  %v1209_v37 = vrot.slane %v1208_v18, 4  ;;  %6760 = vst [vmem:[#allocation66_spill] sm:$0xff] %v5257_v16 }
 0x1b2   : > { %v5219_v45 = vpop.f32.mrb[30].mxu0  ;;  %6756 = vst [vmem:[#allocation62_spill] sm:$0xff] %v5245_v48  ;;  %6757 = vst [vmem:[#allocation63_spill] sm:$0xff] %v5247_v46  ;;  %4099 = vmatpush3.bf16.msra.mxu1 %v4374_v47  ;;  %v5253_v21 = vrot.slane %v1259_v44, 5  ;;  %v1773_v4 = vpack.c.b16 %v996_v24, %v5040_v26  ;;  %v942_v8 = vpack.c.bf16 %v5086_v53, %v5060_v25  ;;  %v1002_v24 = vunpack.c.l.b16 %v943_v58 }
 0x1b3   : > { %v5226_v10 = vpop.f32.mrb[31].mxu0  ;;  %6755 = vst [vmem:[#allocation61_spill] sm:$0xff] %v5243_v1  ;;  %6758 = vst [vmem:[#allocation64_spill] sm:$0xff] %v5249_v22  ;;  %4132 = vmatprep.subr.bf16.mxu1 %v5231_v41  ;;  %v1204_v47 = vsel %vm4855_vm13, %v1199_v19, %v5097_v7  ;;  %v1214_v18 = vsel %vm4855_vm13, %v1209_v37, %v5043_v40  ;;  %v5273_v42 = vpack.c.bf16 %v5086_v53, %v5086_v53 }
 0x1b4   : > { %6759 = vst [vmem:[#allocation65_spill] sm:$0xff] %v5251_v59  ;;  %v3631_v25 = vcombine.low %v1204_v47, %v1214_v18  ;;  %v1283_v54 = vshll.u32 %v5257_v16, 16  ;;  %v2562_v61 = vshrl.u32 %v5257_v16, 16  ;;  %4061 = vmatmul.mubr.bf16.gmra.mrb[8].mxu1 %v1773_v4  ;;  %v1001_v19 = vunpack.c.h.b16 %v942_v8 }
 0x1b5   : > { %6761 = vst [vmem:[#allocation67_spill] sm:$0xff] %v5273_v42  ;;  %v1264_v40 = vshrl.u32 %v5273_v42, 16  ;;  %v1267_v37 = vshll.u32 %v5273_v42, 16  ;;  %v6762_v53 = vpack.c.bf16 %v4996_v50, %v4972_v5  ;;  %v1222_v8 = vor.u32 %v5076_v60, %v5057_v31 }
 0x1b6   : > { %4012 = vmatprep.mubr.bf16.mxu0 %v3631_v25  ;;  %v5289_v58 = vrot.slane %v2562_v61, 5  ;;  %v5291_v18 = vrot.slane %v1283_v54, 6  ;;  %v5298_v7 = vrot.slane %v1283_v54, 5  ;;  %v5312_v31 = vpack.c.bf16 %v5125_v57, %v5125_v57 }
 0x1b7   : > { %4064 = vmatprep.mubr.bf16.mxu1 %v6762_v53  ;;  %v5300_v22 = vrot.slane %v1264_v40, 4  ;;  %v5302_v5 = vrot.slane %v1267_v37, 5  ;;  %v5304_v50 = vrot.slane %v1264_v40, 5  ;;  %v1223_v61 = vrot.slane %v1222_v8, 4 }
 0x1b8   : > { %v5275_v26 = vpop.f32.mrb[32].mxu0  ;;  %6763 = vst [vmem:[#allocation68_spill] sm:$0xff] %v5289_v58  ;;  %6764 = vst [vmem:[#allocation69_spill] sm:$0xff] %v5291_v18  ;;  %v1232_v53 = vor.u32 %v5153_v9, %v5151_v35  ;;  %v5314_v60 = vrot.slane %v1267_v37, 6  ;;  %v5318_v54 = vpack.c.bf16 %v5132_v51, %v5132_v51  ;;  %v945_v40 = vpack.c.bf16 %v5144_v36, %v5125_v57 }
 0x1b9   : > { %v5279_v44 = vpop.f32.mrb[33].mxu0  ;;  %6765 = vst [vmem:[#allocation70_spill] sm:$0xff] %v5304_v50  ;;  %6766 = vst [vmem:[#allocation71_spill] sm:$0xff] %v5312_v31  ;;  %v1775_v4 = vpack.c.b16 %v1002_v24, %v1001_v19  ;;  %v1228_v8 = vsel %vm4855_vm13, %v1223_v61, %v5151_v35  ;;  %v1307_v9 = vshll.u32 %v5312_v31, 16  ;;  %v5328_v58 = vpack.c.bf16 %v5144_v36, %v5144_v36 }
 0x1ba   : > { %v5287_v47 = vpop.f32.mrb[34].mxu0  ;;  %6767 = vst [vmem:[#allocation72_spill] sm:$0xff] %v5314_v60  ;;  %6768 = vst [vmem:[#allocation73_spill] sm:$0xff] %v5318_v54  ;;  %v1233_v25 = vrot.slane %v1232_v53, 4  ;;  %v2577_v18 = vshrl.u32 %v5312_v31, 16  ;;  %v1288_v59 = vshrl.u32 %v5318_v54, 16  ;;  %v5350_v60 = vunpack.c.h.b16 %v945_v40 }
 0x1bb   : > { %v5296_v27 = vpop.f32.mrb[35].mxu0  ;;  %6769 = vst [vmem:[#allocation74_spill] sm:$0xff] %v5328_v58  ;;  %v1291_v57 = vshll.u32 %v5318_v54, 16  ;;  %v5339_v19 = vrot.slane %v1307_v9, 5  ;;  %v5341_v61 = vrot.slane %v1307_v9, 6  ;;  %v1315_v9 = vshll.u32 %v5328_v58, 16 }
 0x1bc   : > { %v1238_v35 = vsel %vm4855_vm13, %v1233_v25, %v5221_v33  ;;  %4065 = vmatmul.mubr.bf16.gmra.mrb[12].mxu1 %v1775_v4  ;;  %v5346_v46 = vrot.slane %v2577_v18, 5  ;;  %v5348_v48 = vrot.slane %v1288_v59, 4  ;;  %v5356_v33 = vrot.slane %v1288_v59, 5 }
 0x1bd   : > { %6770 = vst [vmem:[#allocation75_spill] sm:$0xff] %v5341_v61  ;;  %v3632_v37 = vcombine.low %v1228_v8, %v1238_v35  ;;  %v5354_v41 = vrot.slane %v1291_v57, 5  ;;  %v1312_v25 = vshrl.u32 %v5328_v58, 16  ;;  %v5364_v8 = vrot.slane %v1291_v57, 6 }
 0x1be   : > { %6771 = vst [vmem:[#allocation76_spill] sm:$0xff] %v5346_v46  ;;  %6772 = vst [vmem:[#allocation77_spill] sm:$0xff] %v5356_v33  ;;  %v944_v40 = vpack.c.bf16 %v5159_v17, %v5132_v51  ;;  %v5370_v35 = vpack.c.bf16 %v5159_v17, %v5159_v17  ;;  %v5374_v36 = vrot.slane %v1315_v9, 5  ;;  %v1246_v51 = vor.u32 %v5121_v28, %v5119_v49 }
 0x1bf   : > { %4013 = vmatmul.mubr.bf16.gmra.mrb[56].mxu0 %v3632_v37  ;;  %6773 = vst [vmem:[#allocation78_spill] sm:$0xff] %v5364_v8  ;;  %v5372_v59 = vrot.slane %v1312_v25, 4  ;;  %v5377_v31 = vrot.slane %v1312_v25, 5  ;;  %v5384_v17 = vrot.slane %v1315_v9, 6  ;;  %v1256_v46 = vor.u32 %v5180_v15, %v5178_v2 }
 0x1c0   : > { %v5334_v24 = vpop.f32.mrb[36].mxu0  ;;  %6774 = vst [vmem:[#allocation79_spill] sm:$0xff] %v5370_v35  ;;  %v1297_v37 = vshll.u32 %v5370_v35, 16  ;;  %v1301_v57 = vshrl.u32 %v5370_v35, 16  ;;  %4068 = vmatprep.mubr.bf16.mxu1 %v944_v40  ;;  %v5390_v33 = vpack.c.bf16 %v5199_v32, %v5199_v32  ;;  %v5394_v25 = vpack.c.bf16 %v5210_v6, %v5210_v6 }
 0x1c1   : > { %v5344_v53 = vpop.f32.mrb[37].mxu0  ;;  %6775 = vst [vmem:[#allocation80_spill] sm:$0xff] %v5377_v31  ;;  %6776 = vst [vmem:[#allocation81_spill] sm:$0xff] %v5384_v17  ;;  %v6779_v49 = vrot.slane %v5370_v35, 5  ;;  %v1270_v9 = vor.u32 %v5302_v5, %v5300_v22  ;;  %v1247_v17 = vrot.slane %v1246_v51, 4  ;;  %v1257_v31 = vrot.slane %v1256_v46, 4 }
 0x1c2   : > { %v5352_v50 = vpop.f32.mrb[38].mxu0  ;;  %6777 = vst [vmem:[#allocation82_spill] sm:$0xff] %v5390_v33  ;;  %6778 = vst [vmem:[#allocation83_spill] sm:$0xff] %v5394_v25  ;;  %v5396_v61 = vrot.slane %v1297_v37, 5  ;;  %v5398_v18 = vrot.slane %v1301_v57, 4  ;;  %v5408_v40 = vrot.slane %v1301_v57, 5 }
 0x1c3   : > { %v5360_v4 = vpop.f32.mrb[39].mxu0  ;;  %v5402_v28 = vrot.slane %v6779_v49, 4  ;;  %v1336_v8 = vshrl.u32 %v5390_v33, 16  ;;  %v5413_v54 = vrot.slane %v1297_v37, 6  ;;  %v1339_v1 = vshll.u32 %v5390_v33, 16 }
 0x1c4   : > { %6781 = vst [vmem:[#allocation85_spill] sm:$0xff] %v5408_v40  ;;  %v1321_v49 = vshll.u32 %v5394_v25, 16  ;;  %v1252_v22 = vsel %vm4855_vm13, %v1247_v17, %v5178_v2  ;;  %v1262_v46 = vsel %vm4855_vm13, %v1257_v31, %v5253_v21  ;;  %v1271_v31 = vrot.slane %v1270_v9, 4 }
 0x1c5   : > { %6780 = vst [vmem:[#allocation84_spill] sm:$0xff] %v5402_v28  ;;  %6782 = vst [vmem:[#allocation86_spill] sm:$0xff] %v5413_v54  ;;  %v1325_v28 = vshrl.u32 %v5394_v25, 16  ;;  %v5426_v5 = vrot.slane %v1336_v8, 4  ;;  %v3633_v51 = vcombine.low %v1252_v22, %v1262_v46  ;;  %v5431_v54 = vrot.slane %v1339_v1, 5 }
 0x1c6   : > { %v5433_v40 = vrot.slane %v1336_v8, 5  ;;  %v5435_v16 = vrot.slane %v1339_v1, 6  ;;  %v5437_v42 = vrot.slane %v1321_v49, 5  ;;  %v1280_v37 = vor.u32 %v5239_v30, %v5235_v29 }
 0x1c7   : > { %v5439_v2 = vrot.slane %v1325_v28, 4  ;;  %v5442_v21 = vrot.slane %v1325_v28, 5  ;;  %4016 = vmatprep.mubr.bf16.mxu0 %v3633_v51  ;;  %v5450_v1 = vpack.c.bf16 %v5219_v45, %v5219_v45  ;;  %v5452_v8 = vrot.slane %v1321_v49, 6 }
 0x1c8   : > { %v5406_v15 = vpop.f32.mrb[40].mxu0  ;;  %6783 = vst [vmem:[#allocation87_spill] sm:$0xff] %v5433_v40  ;;  %6784 = vst [vmem:[#allocation88_spill] sm:$0xff] %v5435_v16  ;;  %v946_v46 = vpack.c.bf16 %v5226_v10, %v5210_v6  ;;  %v5458_v28 = vpack.c.bf16 %v5226_v10, %v5226_v10  ;;  %v5462_v9 = vpack.c.bf16 %v5275_v26, %v5275_v26  ;;  %v1281_v51 = vrot.slane %v1280_v37, 4 }
 0x1c9   : > { %v5411_v58 = vpop.f32.mrb[41].mxu0  ;;  %6785 = vst [vmem:[#allocation89_spill] sm:$0xff] %v5442_v21  ;;  %6786 = vst [vmem:[#allocation90_spill] sm:$0xff] %v5450_v1  ;;  %v1276_v30 = vsel %vm4855_vm13, %v1271_v31, %v5235_v29  ;;  %v1345_v22 = vshll.u32 %v5450_v1, 16  ;;  %v1349_v49 = vshrl.u32 %v5450_v1, 16  ;;  %v6789_v6 = vrot.slane %v5394_v25, 5 }
 0x1ca   : > { %v5418_v35 = vpop.f32.mrb[42].mxu0  ;;  %6787 = vst [vmem:[#allocation91_spill] sm:$0xff] %v5452_v8  ;;  %6788 = vst [vmem:[#allocation92_spill] sm:$0xff] %v5458_v28  ;;  %v6669_v10 = vrot.slane %v5450_v1, 5  ;;  %v1008_v40 = vunpack.c.l.b16 %v946_v46  ;;  %v1331_v8 = vshll.u32 %v5458_v28, 16  ;;  %v1286_v29 = vsel %vm4855_vm13, %v1281_v51, %v5298_v7 }
 0x1cb   : > { %v5429_v57 = vpop.f32.mrb[43].mxu0  ;;  %v5473_v16 = vrot.slane %v6789_v6, 4  ;;  %v5482_v37 = vrot.slane %v1345_v22, 5  ;;  %v5484_v31 = vrot.slane %v1349_v49, 4  ;;  %v3634_v6 = vcombine.low %v1276_v30, %v1286_v29 }
 0x1cc   : > { %v5491_v46 = vrot.slane %v6669_v10, 4  ;;  %v5495_v20 = vrot.slane %v1345_v22, 6  ;;  %v2592_v7 = vshrl.u32 %v5458_v28, 16  ;;  %v5500_v51 = vrot.slane %v1331_v8, 6 }
 0x1cd   : > { %6790 = vst [vmem:[#allocation93_spill] sm:$0xff] %v5473_v16  ;;  %v5493_v16 = vrot.slane %v1349_v49, 5  ;;  %v1369_v13 = vshll.u32 %v5462_v9, 16  ;;  %v1373_v33 = vshrl.u32 %v5462_v9, 16  ;;  %4017 = vmatmul.mubr.bf16.gmra.mrb[60].mxu0 %v3634_v6  ;;  %v6673_v30 = vrot.slane %v5462_v9, 5 }
 0x1ce   : > { %6791 = vst [vmem:[#allocation94_spill] sm:$0xff] %v5491_v46  ;;  %6793 = vst [vmem:[#allocation96_spill] sm:$0xff] %v5495_v20  ;;  %v5507_v29 = vpack.c.bf16 %v5279_v44, %v5279_v44  ;;  %v1294_v22 = vor.u32 %v5354_v41, %v5348_v48  ;;  %v1304_v49 = vor.u32 %v5398_v18, %v5396_v61  ;;  %v1333_v10 = vrot.slane %v1331_v8, 5 }
 0x1cf   : > { %6792 = vst [vmem:[#allocation95_spill] sm:$0xff] %v5493_v16  ;;  %6794 = vst [vmem:[#allocation97_spill] sm:$0xff] %v5500_v51  ;;  %v5513_v20 = vrot.slane %v2592_v7, 5  ;;  %v5515_v16 = vrot.slane %v1369_v13, 5  ;;  %v5517_v46 = vrot.slane %v1373_v33, 4  ;;  %v5521_v6 = vrot.slane %v6673_v30, 4 }
 0x1d0   : > { %v5469_v17 = vpop.f32.mrb[44].mxu0  ;;  %v5523_v1 = vrot.slane %v1373_v33, 5  ;;  %v5525_v28 = vrot.slane %v1369_v13, 6  ;;  %v1355_v48 = vshll.u32 %v5507_v29, 16  ;;  %v2607_v18 = vshrl.u32 %v5507_v29, 16 }
 0x1d1   : > { %v5477_v21 = vpop.f32.mrb[45].mxu0  ;;  %6795 = vst [vmem:[#allocation98_spill] sm:$0xff] %v5513_v20  ;;  %v1295_v8 = vrot.slane %v1294_v22, 4  ;;  %v1305_v7 = vrot.slane %v1304_v49, 4  ;;  %v949_v30 = vpack.c.bf16 %v5287_v47, %v5275_v26  ;;  %v5538_v13 = vpack.c.bf16 %v5287_v47, %v5287_v47 }
 0x1d2   : > { %v5487_v25 = vpop.f32.mrb[46].mxu0  ;;  %6796 = vst [vmem:[#allocation99_spill] sm:$0xff] %v5523_v1  ;;  %6797 = vst [vmem:[#allocation100_spill] sm:$0xff] %v5525_v28  ;;  %v5532_v11 = vrot.slane %v1355_v48, 6  ;;  %v5540_v33 = vrot.slane %v2607_v18, 5  ;;  %v1777_v49 = vpack.c.b16 %v1008_v40, %v5350_v60  ;;  %v5549_v12 = vrot.slane %v1355_v48, 5 }
 0x1d3   : > { %v5497_v39 = vpop.f32.mrb[47].mxu0  ;;  %v1300_v41 = vsel %vm4855_vm13, %v1295_v8, %v5396_v61  ;;  %v1310_v22 = vsel %vm4855_vm13, %v1305_v7, %v5339_v19  ;;  %v1014_v26 = vunpack.c.l.b16 %v949_v30  ;;  %v1379_v51 = vshll.u32 %v5538_v13, 16 }
 0x1d4   : > { %6798 = vst [vmem:[#allocation101_spill] sm:$0xff] %v5532_v11  ;;  %6799 = vst [vmem:[#allocation102_spill] sm:$0xff] %v5540_v33  ;;  %v3635_v20 = vcombine.low %v1300_v41, %v1310_v22  ;;  %v2622_v18 = vshrl.u32 %v5538_v13, 16  ;;  %4069 = vmatmul.mubr.bf16.gmra.mrb[16].mxu1 %v1777_v49  ;;  %v948_v61 = vpack.c.bf16 %v5296_v27, %v5279_v44 }
 0x1d5   : > { %v5559_v19 = vpack.c.bf16 %v5296_v27, %v5296_v27  ;;  %v5562_v40 = vrot.slane %v1379_v51, 6  ;;  %v6801_v30 = vpack.c.bf16 %v5219_v45, %v5199_v32  ;;  %v1318_v48 = vor.u32 %v5374_v36, %v5372_v59 }
 0x1d6   : > { %4020 = vmatprep.mubr.bf16.mxu0 %v3635_v20  ;;  %v1328_v41 = vor.u32 %v5439_v2, %v5437_v42  ;;  %v5571_v44 = vrot.slane %v1379_v51, 5  ;;  %v5573_v8 = vrot.slane %v2622_v18, 5  ;;  %v1013_v7 = vunpack.c.h.b16 %v948_v61 }
 0x1d7   : > { %6800 = vst [vmem:[#allocation103_spill] sm:$0xff] %v5562_v40  ;;  %4072 = vmatprep.mubr.bf16.mxu1 %v6801_v30  ;;  %v1360_v20 = vshrl.u32 %v5559_v19, 16  ;;  %v1363_v27 = vshll.u32 %v5559_v19, 16  ;;  %v1319_v22 = vrot.slane %v1318_v48, 4  ;;  %v5579_v45 = vpack.c.bf16 %v5334_v24, %v5334_v24 }
 0x1d8   : > { %6802 = vst [vmem:[#allocation104_spill] sm:$0xff] %v5573_v8  ;;  %v1329_v49 = vrot.slane %v1328_v41, 4  ;;  %v5601_v47 = vpack.c.bf16 %v5344_v53, %v5344_v53  ;;  %v1779_v11 = vpack.c.b16 %v1014_v26, %v1013_v7  ;;  %v5661_v7 = vpack.c.bf16 %v5411_v58, %v5411_v58 }
 0x1d9   : > { %v5583_v36 = vrot.slane %v1360_v20, 4  ;;  %v5585_v59 = vrot.slane %v1363_v27, 5  ;;  %v5588_v51 = vrot.slane %v1360_v20, 5  ;;  %v1324_v18 = vsel %vm4855_vm13, %v1319_v22, %v5437_v42 }
 0x1da   : > { %v1334_v61 = vsel %vm4855_vm13, %v1329_v49, %v1333_v10  ;;  %v1403_v30 = vshll.u32 %v5579_v45, 16  ;;  %v5596_v48 = vrot.slane %v1363_v27, 6  ;;  %v2637_v32 = vshrl.u32 %v5579_v45, 16 }
 0x1db   : > { %6803 = vst [vmem:[#allocation105_spill] sm:$0xff] %v5588_v51  ;;  %v3636_v41 = vcombine.low %v1324_v18, %v1334_v61  ;;  %v951_v42 = vpack.c.bf16 %v5352_v50, %v5334_v24  ;;  %v5610_v10 = vpack.c.bf16 %v5352_v50, %v5352_v50  ;;  %v1384_v49 = vshrl.u32 %v5601_v47, 16 }
 0x1dc   : > { %6804 = vst [vmem:[#allocation106_spill] sm:$0xff] %v5596_v48  ;;  %v5604_v60 = vrot.slane %v1403_v30, 6  ;;  %v5612_v27 = vrot.slane %v1403_v30, 5  ;;  %v5614_v22 = vrot.slane %v2637_v32, 5  ;;  %v1387_v18 = vshll.u32 %v5601_v47, 16  ;;  %4073 = vmatmul.mubr.bf16.gmra.mrb[20].mxu1 %v1779_v11 }
 0x1dd   : > { %4021 = vmatmul.mubr.bf16.gmra.mrb[64].mxu0 %v3636_v41  ;;  %v5619_v20 = vunpack.c.h.b16 %v951_v42  ;;  %v1408_v2 = vshrl.u32 %v5610_v10, 16  ;;  %v1411_v24 = vshll.u32 %v5610_v10, 16  ;;  %v5625_v41 = vrot.slane %v1384_v49, 4 }
 0x1de   : > { %6805 = vst [vmem:[#allocation107_spill] sm:$0xff] %v5604_v60  ;;  %6806 = vst [vmem:[#allocation108_spill] sm:$0xff] %v5614_v22  ;;  %v5627_v30 = vrot.slane %v1387_v18, 5  ;;  %v5630_v8 = vrot.slane %v1384_v49, 5  ;;  %v5632_v40 = vrot.slane %v1387_v18, 6  ;;  %v950_v50 = vpack.c.bf16 %v5360_v4, %v5344_v53 }
 0x1df   : > { %v5634_v61 = vrot.slane %v1408_v2, 4  ;;  %v5636_v42 = vrot.slane %v1411_v24, 5  ;;  %v5638_v33 = vrot.slane %v1408_v2, 5  ;;  %v5644_v22 = vpack.c.bf16 %v5360_v4, %v5360_v4 }
 0x1e0   : > { %6807 = vst [vmem:[#allocation109_spill] sm:$0xff] %v5630_v8  ;;  %6808 = vst [vmem:[#allocation110_spill] sm:$0xff] %v5632_v40  ;;  %v5646_v60 = vrot.slane %v1411_v24, 6  ;;  %v1342_v49 = vor.u32 %v5431_v54, %v5426_v5  ;;  %v1352_v18 = vor.u32 %v5484_v31, %v5482_v37  ;;  %v5654_v2 = vpack.c.bf16 %v5406_v15, %v5406_v15 }
 0x1e1   : > { %6809 = vst [vmem:[#allocation111_spill] sm:$0xff] %v5638_v33  ;;  %v1393_v26 = vshll.u32 %v5644_v22, 16  ;;  %v1397_v53 = vshrl.u32 %v5644_v22, 16  ;;  %v6682_v4 = vrot.slane %v5644_v22, 5  ;;  %4076 = vmatprep.mubr.bf16.mxu1 %v950_v50  ;;  %v1366_v33 = vor.u32 %v5585_v59, %v5583_v36 }
 0x1e2   : > { %6810 = vst [vmem:[#allocation112_spill] sm:$0xff] %v5646_v60  ;;  %6811 = vst [vmem:[#allocation113_spill] sm:$0xff] %v5654_v2  ;;  %v1343_v24 = vrot.slane %v1342_v49, 4  ;;  %v1353_v54 = vrot.slane %v1352_v18, 4  ;;  %v1432_v5 = vshrl.u32 %v5654_v2, 16  ;;  %v1435_v31 = vshll.u32 %v5654_v2, 16 }
 0x1e3   : > { %v5665_v32 = vrot.slane %v1393_v26, 5  ;;  %v5667_v11 = vrot.slane %v1397_v53, 4  ;;  %v5671_v60 = vrot.slane %v6682_v4, 4  ;;  %v5675_v40 = vrot.slane %v1397_v53, 5 }
 0x1e4   : > { %v5677_v49 = vrot.slane %v1393_v26, 6  ;;  %v1348_v50 = vsel %vm4855_vm13, %v1343_v24, %v5482_v37  ;;  %v1358_v18 = vsel %vm4855_vm13, %v1353_v54, %v5549_v12  ;;  %v5685_v28 = vrot.slane %v1432_v5, 4 }
 0x1e5   : > { %6812 = vst [vmem:[#allocation114_spill] sm:$0xff] %v5675_v40  ;;  %v3637_v8 = vcombine.low %v1348_v50, %v1358_v18  ;;  %v5687_v4 = vrot.slane %v1435_v31, 5  ;;  %v5690_v36 = vrot.slane %v1432_v5, 5  ;;  %v1417_v59 = vshll.u32 %v5661_v7, 16 }
 0x1e6   : > { %6813 = vst [vmem:[#allocation115_spill] sm:$0xff] %v5677_v49  ;;  %v1421_v26 = vshrl.u32 %v5661_v7, 16  ;;  %v6683_v53 = vrot.slane %v5661_v7, 5  ;;  %v1367_v37 = vrot.slane %v1366_v33, 4  ;;  %v1376_v12 = vor.u32 %v5517_v46, %v5515_v16 }
 0x1e7   : > { %6814 = vst [vmem:[#allocation116_spill] sm:$0xff] %v5690_v36  ;;  %4024 = vmatprep.mubr.bf16.mxu0 %v3637_v8  ;;  %v5701_v54 = vpack.c.bf16 %v5418_v35, %v5418_v35  ;;  %v5703_v5 = vrot.slane %v1435_v31, 6  ;;  %v5705_v50 = vrot.slane %v1417_v59, 5  ;;  %v952_v36 = vpack.c.bf16 %v5429_v57, %v5411_v58 }
 0x1e8   : > { %v5707_v18 = vrot.slane %v1421_v26, 4  ;;  %v5711_v8 = vrot.slane %v6683_v53, 4  ;;  %v5713_v33 = vrot.slane %v1421_v26, 5  ;;  %v1372_v46 = vsel %vm4855_vm13, %v1367_v37, %v5515_v16 }
 0x1e9   : > { %6815 = vst [vmem:[#allocation117_spill] sm:$0xff] %v5703_v5  ;;  %v1377_v1 = vrot.slane %v1376_v12, 4  ;;  %v1441_v24 = vshll.u32 %v5701_v54, 16  ;;  %v1445_v31 = vshrl.u32 %v5701_v54, 16  ;;  %v5725_v53 = vpack.c.bf16 %v5429_v57, %v5429_v57 }
 0x1ea   : > { %6816 = vst [vmem:[#allocation118_spill] sm:$0xff] %v5713_v33  ;;  %v5727_v26 = vrot.slane %v1417_v59, 6  ;;  %v5736_v12 = vpack.c.bf16 %v5469_v17, %v5469_v17  ;;  %v6819_v58 = vrot.slane %v5701_v54, 5 }
 0x1eb   : > { %v1382_v16 = vsel %vm4855_vm13, %v1377_v1, %v5571_v44  ;;  %v5732_v37 = vrot.slane %v1441_v24, 5  ;;  %v5738_v33 = vrot.slane %v1445_v31, 4  ;;  %v5744_v57 = vrot.slane %v1441_v24, 6 }
 0x1ec   : > { %6817 = vst [vmem:[#allocation119_spill] sm:$0xff] %v5727_v26  ;;  %6818 = vst [vmem:[#allocation120_spill] sm:$0xff] %v5736_v12  ;;  %v3638_v5 = vcombine.low %v1372_v46, %v1382_v16  ;;  %v5742_v49 = vrot.slane %v6819_v58, 4  ;;  %v5746_v59 = vrot.slane %v1445_v31, 5  ;;  %v1020_v26 = vunpack.c.l.b16 %v952_v36 }
 0x1ed   : > { %6821 = vst [vmem:[#allocation122_spill] sm:$0xff] %v5744_v57  ;;  %v1427_v1 = vshll.u32 %v5725_v53, 16  ;;  %v2652_v44 = vshrl.u32 %v5725_v53, 16  ;;  %v1465_v40 = vshll.u32 %v5736_v12, 16  ;;  %v1469_v46 = vshrl.u32 %v5736_v12, 16 }
 0x1ee   : > { %6820 = vst [vmem:[#allocation121_spill] sm:$0xff] %v5742_v49  ;;  %6822 = vst [vmem:[#allocation123_spill] sm:$0xff] %v5746_v59  ;;  %4025 = vmatmul.mubr.bf16.gmra.mrb[68].mxu0 %v3638_v5  ;;  %v6686_v16 = vrot.slane %v5736_v12, 5  ;;  %v5755_v58 = vpack.c.bf16 %v5477_v21, %v5477_v21  ;;  %v1390_v57 = vor.u32 %v5627_v30, %v5625_v41 }
 0x1ef   : > { %v5758_v31 = vrot.slane %v2652_v44, 5  ;;  %v5760_v36 = vrot.slane %v1427_v1, 6  ;;  %v1429_v5 = vrot.slane %v1427_v1, 5  ;;  %v5764_v59 = vrot.slane %v1465_v40, 5 }
 0x1f0   : > { %v5766_v48 = vrot.slane %v1469_v46, 4  ;;  %v5770_v51 = vrot.slane %v6686_v16, 4  ;;  %v5774_v24 = vrot.slane %v1469_v46, 5  ;;  %v5776_v44 = vrot.slane %v1465_v40, 6 }
 0x1f1   : > { %6823 = vst [vmem:[#allocation124_spill] sm:$0xff] %v5758_v31  ;;  %6824 = vst [vmem:[#allocation125_spill] sm:$0xff] %v5760_v36  ;;  %v1451_v2 = vshll.u32 %v5755_v58, 16  ;;  %v2667_v41 = vshrl.u32 %v5755_v58, 16  ;;  %v1391_v30 = vrot.slane %v1390_v57, 4  ;;  %v1400_v1 = vor.u32 %v5667_v11, %v5665_v32 }
 0x1f2   : > { %6825 = vst [vmem:[#allocation126_spill] sm:$0xff] %v5770_v51  ;;  %v955_v12 = vpack.c.bf16 %v5487_v25, %v5469_v17  ;;  %v5789_v46 = vpack.c.bf16 %v5487_v25, %v5487_v25  ;;  %v1781_v40 = vpack.c.b16 %v1020_v26, %v5619_v20  ;;  %v954_v25 = vpack.c.bf16 %v5497_v39, %v5477_v21 }
 0x1f3   : > { %v5785_v51 = vrot.slane %v1451_v2, 6  ;;  %v1453_v49 = vrot.slane %v1451_v2, 5  ;;  %v5792_v31 = vrot.slane %v2667_v41, 5  ;;  %v1396_v11 = vsel %vm4855_vm13, %v1391_v30, %v5665_v32 }
 0x1f4   : > { %v1401_v57 = vrot.slane %v1400_v1, 4  ;;  %v1026_v36 = vunpack.c.l.b16 %v955_v12  ;;  %v1475_v17 = vshll.u32 %v5789_v46, 16  ;;  %v2682_v16 = vshrl.u32 %v5789_v46, 16  ;;  %4077 = vmatmul.mubr.bf16.gmra.mrb[24].mxu1 %v1781_v40 }
 0x1f5   : > { %v5808_v32 = vpack.c.bf16 %v5497_v39, %v5497_v39  ;;  %v6826_v26 = vpack.c.bf16 %v5418_v35, %v5406_v15  ;;  %v1414_v12 = vor.u32 %v5636_v42, %v5634_v61  ;;  %v2122_v21 = vrot.slane %v5789_v46, 5  ;;  %v6909_v46 = vld [vmem:[#allocation7_spill] sm:$0xff] }
 0x1f6   : > { %v1406_v2 = vsel %vm4855_vm13, %v1401_v57, %v5612_v27  ;;  %v5816_v30 = vrot.slane %v2682_v16, 5  ;;  %v5818_v1 = vrot.slane %v1475_v17, 6  ;;  %v1477_v40 = vrot.slane %v1475_v17, 5 }
 0x1f7   : > { %4080 = vmatprep.mubr.bf16.mxu1 %v6826_v26  ;;  %v3639_v41 = vcombine.low %v1396_v11, %v1406_v2  ;;  %v1025_v27 = vunpack.c.h.b16 %v954_v25  ;;  %v1456_v57 = vshrl.u32 %v5808_v32, 16  ;;  %v1459_v39 = vshll.u32 %v5808_v32, 16 }
 0x1f8   : > { %v1415_v15 = vrot.slane %v1414_v12, 4  ;;  %v1424_v61 = vor.u32 %v5707_v18, %v5705_v50  ;;  %v1438_v42 = vor.u32 %v5687_v4, %v5685_v28  ;;  %v3674_v17 = vrot.slane %v5808_v32, 9 }
 0x1f9   : > { %4028 = vmatprep.mubr.bf16.mxu0 %v3639_v41  ;;  %v1458_v16 = vrot.slane %v1456_v57, 4  ;;  %v1461_v11 = vrot.slane %v1459_v39, 5  ;;  %v5831_v25 = vrot.slane %v1456_v57, 5  ;;  %v1783_v12 = vpack.c.b16 %v1026_v36, %v1025_v27 }
 0x1fa   : > { %v1420_v2 = vsel %vm4855_vm13, %v1415_v15, %v5705_v50  ;;  %v1425_v26 = vrot.slane %v1424_v61, 4  ;;  %v1439_v41 = vrot.slane %v1438_v42, 4  ;;  %v1448_v18 = vor.u32 %v5738_v33, %v5732_v37 }
 0x1fb   : > { %v6827_v28 = vrot.slane %v4789_v23, 5  ;;  %v6828_v4 = vrot.slane %v4758_v0, 9  ;;  %v6829_v57 = vrot.slane %v4756_v62, 5  ;;  %v1462_v50 = vor.u32 %v1461_v11, %v1458_v16  ;;  %v6837_v11 = vld [vmem:[#allocation21_spill] sm:$0xff] }
 0x1fc   : > { %v1430_v36 = vsel %vm4855_vm13, %v1425_v26, %v1429_v5  ;;  %4081 = vmatmul.mubr.bf16.gmra.mrb[28].mxu1 %v1783_v12  ;;  %v1444_v23 = vsel %vm4855_vm13, %v1439_v41, %v5732_v37  ;;  %v1472_v0 = vor.u32 %v5766_v48, %v5764_v59  ;;  %v1449_v15 = vrot.slane %v1448_v18, 4  ;;  %v6838_v41 = vld [vmem:[#allocation38_spill] sm:$0xff] }
 0x1fd   : > { %v2015_v35 = vsel %vm4845_vm12, %v6828_v4, %v6827_v28  ;;  %v2018_v20 = vsel %vm4845_vm12, %v4816_v43, %v6829_v57  ;;  %v3640_v27 = vcombine.low %v1420_v2, %v1430_v36  ;;  %v1463_v62 = vrot.slane %v1462_v50, 4  ;;  %v6840_v28 = vld [vmem:[#allocation31_spill] sm:$0xff] }
 0x1fe   : > { %v3675_v33 = vcombine.low %v2015_v35, %v2018_v20  ;;  %v6830_v61 = vrot.slane %v4835_v56, 5  ;;  %v6831_v43 = vrot.slane %v4800_v34, 9  ;;  %v1473_v5 = vrot.slane %v1472_v0, 4  ;;  %v6835_v34 = vld [vmem:[#allocation25_spill] sm:$0xff]  ;;  %v6844_v36 = vld [vmem:[#allocation43_spill] sm:$0xff]  ;;  %v6845_v0 = vld [vmem:[#allocation42_spill] sm:$0xff] }
 0x1ff   : > { %v6832_v16 = vrot.slane %v4900_v55, 5  ;;  %v6833_v48 = vrot.slane %v4896_v52, 5  ;;  %v6834_v20 = vrot.slane %v4959_v14, 9  ;;  %v6836_v35 = vrot.slane %v6835_v34, 5  ;;  %4029 = vmatmul.mubr.bf16.gmra.mrb[72].mxu0 %v3640_v27 }
 0x200   : > { %v2029_v42 = vsel %vm4845_vm12, %v6831_v43, %v6830_v61  ;;  %4100 = vmatprep.mubr.bf16.mxu1 %v3675_v33  ;;  %v1454_v55 = vsel %vm4855_vm13, %v1449_v15, %v1453_v49  ;;  %v1478_v12 = vsel %vm4855_vm13, %v1473_v5, %v1477_v40  ;;  %v6839_v18 = vrot.slane %v6838_v41, 5  ;;  %v6842_v49 = vld [vmem:[#allocation30_spill] sm:$0xff]  ;;  %v6847_v40 = vld [vmem:[#allocation32_spill] sm:$0xff]  ;;  %v6851_v43 = vld [vmem:[#allocation49_spill] sm:$0xff] }
 0x201   : > { %v2032_v37 = vsel %vm4845_vm12, %v4888_v38, %v6832_v16  ;;  %v5873_v56 = vsel %vm4845_vm12, %v6834_v20, %v6833_v48  ;;  %v5880_v2 = vsel %vm4845_vm12, %v6837_v11, %v6836_v35  ;;  %v1468_v38 = vsel %vm4855_vm13, %v1463_v62, %v5764_v59  ;;  %v6849_v62 = vld [vmem:[#allocation52_spill] sm:$0xff]  ;;  %v4376_v5 = vld [vmem:[%s6617_s2 + $0xc8] sm:$0xff]   ;;  %v6854_v20 = vld [vmem:[#allocation41_spill] sm:$0xff] }
 0x202   : > { %v3677_v52 = vcombine.low %v2029_v42, %v2032_v37  ;;  %v3678_v14 = vcombine.low %v5873_v56, %v5880_v2  ;;  %v3641_v26 = vcombine.low %v1444_v23, %v1454_v55  ;;  %v6841_v4 = vrot.slane %v6840_v28, 9  ;;  %v6852_v37 = vld [vmem:[#allocation47_spill] sm:$0xff]  ;;  %v6856_v35 = vld [vmem:[#allocation57_spill] sm:$0xff] }
 0x203   : > { %v6843_v50 = vrot.slane %v6842_v49, 5  ;;  %v3642_v33 = vcombine.low %v1468_v38, %v1478_v12  ;;  %v6846_v3 = vrot.slane %v6845_v0, 5  ;;  %v6848_v27 = vrot.slane %v6847_v40, 9  ;;  %v6858_v2 = vld [vmem:[#allocation53_spill] sm:$0xff]  ;;  %v6859_v38 = vld [vmem:[#allocation56_spill] sm:$0xff]  ;;  %v6861_v12 = vld [vmem:[#allocation67_spill] sm:$0xff] }
 0x204   : > { %v5897_v57 = vsel %vm4845_vm12, %v6841_v4, %v6839_v18  ;;  %v6850_v61 = vrot.slane %v6849_v62, 5  ;;  %4032 = vmatprep.mubr.bf16.mxu0 %v3641_v26  ;;  %v6853_v48 = vrot.slane %v6852_v37, 5  ;;  %v6855_v56 = vrot.slane %v6854_v20, 9  ;;  %v6863_v4 = vld [vmem:[#allocation66_spill] sm:$0xff]  ;;  %v6865_v49 = vld [vmem:[#allocation61_spill] sm:$0xff] }
 0x205   : > { %v2046_v59 = vsel %vm4845_vm12, %v6844_v36, %v6843_v50  ;;  %v5911_v15 = vsel %vm4845_vm12, %v6848_v27, %v6846_v3  ;;  %v6857_v11 = vrot.slane %v6856_v35, 5  ;;  %v6860_v26 = vrot.slane %v6859_v38, 5  ;;  %v6866_v36 = vld [vmem:[#allocation79_spill] sm:$0xff]  ;;  %v6868_v0 = vld [vmem:[#allocation73_spill] sm:$0xff]  ;;  %v6873_v37 = vld [vmem:[#allocation14_spill] sm:$0xff] }
 0x206   : > { %v3679_v23 = vcombine.low %v5897_v57, %v2046_v59  ;;  %v5918_v42 = vsel %vm4845_vm12, %v6851_v43, %v6850_v61  ;;  %v5931_v34 = vsel %vm4845_vm12, %v6855_v56, %v6853_v48  ;;  %v6862_v41 = vrot.slane %v6861_v12, 9  ;;  %v6870_v27 = vld [vmem:[#allocation71_spill] sm:$0xff]  ;;  %v6872_v61 = vld [vmem:[#allocation84_spill] sm:$0xff]  ;;  %v6874_v48 = vld [vmem:[#allocation18_spill] sm:$0xff] }
 0x207   : > { %v3680_v16 = vcombine.low %v5911_v15, %v5918_v42  ;;  %v5938_v55 = vsel %vm4845_vm12, %v6858_v2, %v6857_v11  ;;  %v6864_v57 = vrot.slane %v6863_v4, 5  ;;  %v6867_v59 = vrot.slane %v6866_v36, 5  ;;  %v6876_v11 = vld [vmem:[#allocation83_spill] sm:$0xff]  ;;  %v6878_v38 = vld [vmem:[#allocation74_spill] sm:$0xff]  ;;  %v6883_v36 = vld [vmem:[#allocation60_spill] sm:$0xff]  ;;  %4033 = vmatmul.mubr.bf16.gmra.mrb[76].mxu0 %v3642_v33 }
 0x208   : > { %v5946_v18 = vsel %vm4845_vm12, %v6862_v41, %v6860_v26  ;;  %v3681_v28 = vcombine.low %v5931_v34, %v5938_v55  ;;  %v6869_v3 = vrot.slane %v6868_v0, 9  ;;  %v6871_v62 = vrot.slane %v6870_v27, 5  ;;  %v6880_v41 = vld [vmem:[#allocation92_spill] sm:$0xff]  ;;  %v6884_v0 = vld [vmem:[#allocation90_spill] sm:$0xff]  ;;  %v6957_v15 = vld [vmem:[#allocation59_spill] sm:$0xff] }
 0x209   : > { %v5955_v50 = vsel %vm4845_vm12, %v6865_v49, %v6864_v57  ;;  %v6875_v20 = vcombine.low %v6873_v37, %v6874_v48  ;;  %v6877_v2 = vrot.slane %v6876_v11, 5  ;;  %v6879_v26 = vrot.slane %v6878_v38, 9  ;;  %v6882_v57 = vld [vmem:[#allocation93_spill] sm:$0xff]  ;;  %v6886_v27 = vld [vmem:[#allocation82_spill] sm:$0xff] }
 0x20a   : > { %v5963_v40 = vsel %vm4845_vm12, %v6869_v3, %v6867_v59  ;;  %v5970_v43 = vsel %vm4845_vm12, %v6872_v61, %v6871_v62  ;;  %v3682_v56 = vcombine.low %v5946_v18, %v5955_v50  ;;  %v6881_v4 = vrot.slane %v6880_v41, 5  ;;  %v6889_v48 = vld [vmem:[#allocation94_spill] sm:$0xff] }
 0x20b   : > { %4101 = vmatmul.mubr.bf16.vlgmr.msra.gmra.mrb[0].mxu1 %v6875_v20  ;;  %v3683_v35 = vcombine.low %v5963_v40, %v5970_v43  ;;  %v5985_v12 = vsel %vm4845_vm12, %v6879_v26, %v6877_v2  ;;  %v6885_v3 = vrot.slane %v6884_v0, 5  ;;  %v6887_v62 = vrot.slane %v6886_v27, 9  ;;  %v6958_v42 = vld [vmem:[#allocation58_spill] sm:$0xff]  ;;  %v6997_v43 = vld [vmem:[#allocation103_spill] sm:$0xff] }
 0x20c   : > { %v5992_v49 = vsel %vm4845_vm12, %v6882_v57, %v6881_v4  ;;  %4133 = vmatpush3.bf16.msra.mxu1 %v6883_v36  ;;  %4104 = vmatprep.mubr.bf16.mxu1 %v3677_v52  ;;  %v6888_v37 = vrot.slane %v5507_v29, 5  ;;  %v4377_v52 = vld [vmem:[%s6617_s2 + $0xd0] sm:$0xff]   ;;  %v6890_v2 = vrot.slane %v5462_v9, 5  ;;  %v6891_v38 = vrot.slane %v5559_v19, 9 }
 0x20d   : > { %v3684_v59 = vcombine.low %v5985_v12, %v5992_v49  ;;  %v6003_v61 = vsel %vm4845_vm12, %v6887_v62, %v6885_v3  ;;  %4134 = vmatprep.subr.bf16.mxu1 %v4376_v5  ;;  %v6892_v26 = vrot.slane %v5538_v13, 5  ;;  %v6893_v4 = vrot.slane %v5644_v22, 5  ;;  %v6903_v62 = vld [vmem:[#allocation121_spill] sm:$0xff] }
 0x20e   : > { %v6010_v20 = vsel %vm4845_vm12, %v6889_v48, %v6888_v37  ;;  %v6023_v29 = vsel %vm4845_vm12, %v6891_v38, %v6890_v2  ;;  %v6894_v57 = vrot.slane %v5601_v47, 9  ;;  %v6895_v36 = vrot.slane %v5579_v45, 5  ;;  %v6904_v48 = vld [vmem:[#allocation120_spill] sm:$0xff]  ;;  %v6926_v45 = vld [vmem:[#allocation23_spill] sm:$0xff] }
 0x20f   : > { %v6030_v41 = vsel %vm4845_vm12, %v5521_v6, %v6892_v26  ;;  %v6896_v6 = vrot.slane %v5661_v7, 5  ;;  %v6897_v22 = vrot.slane %v5610_v10, 9  ;;  %v6898_v33 = vrot.slane %v5725_v53, 5  ;;  %v6900_v10 = vld [vmem:[#allocation113_spill] sm:$0xff] }
 0x210   : > { %v6038_v9 = vsel %vm4845_vm12, %v6894_v57, %v6893_v4  ;;  %v6047_v13 = vsel %vm4845_vm12, %v5671_v60, %v6895_v36  ;;  %v6899_v7 = vrot.slane %v5701_v54, 5  ;;  %v6901_v3 = vrot.slane %v6900_v10, 9  ;;  %4135 = vmatpush3.bf16.msra.mxu1 %v4376_v5  ;;  %v4378_v5 = vld [vmem:[%s6617_s2 + $0xd8] sm:$0xff]   ;;  %v6916_v10 = vld [vmem:[#allocation9_spill] sm:$0xff] }
 0x211   : > { %v6055_v47 = vsel %vm4845_vm12, %v6897_v22, %v6896_v6  ;;  %v6062_v0 = vsel %vm4845_vm12, %v5711_v8, %v6898_v33  ;;  %v6902_v53 = vrot.slane %v5755_v58, 5  ;;  %v6905_v2 = vrot.slane %v6904_v48, 5  ;;  %v6906_v58 = vld [vmem:[#allocation126_spill] sm:$0xff]  ;;  %4136 = vmatprep.subr.bf16.mxu1 %v4377_v52  ;;  %v6910_v4 = vld [vmem:[#allocation8_spill] sm:$0xff]  ;;  %v6914_v22 = vld [vmem:[#allocation13_spill] sm:$0xff] }
 0x212   : > { %v6074_v27 = vsel %vm4845_vm12, %v6901_v3, %v6899_v7  ;;  %v6098_v38 = vsel %vm4845_vm12, %v6906_v58, %v2122_v21  ;;  %v2450_v57 = vor.u32 %v6910_v4, %v6909_v46  ;;  %v6912_v21 = vld [vmem:[#allocation11_spill] sm:$0xff]  ;;  %v6913_v6 = vld [vmem:[#allocation12_spill] sm:$0xff]  ;;  %v6922_v4 = vld [vmem:[#allocation17_spill] sm:$0xff]  ;;  %v7013_v12 = vcombine.low %v6023_v29, %v6030_v41 }
 0x213   : > { %v6081_v8 = vsel %vm4845_vm12, %v6903_v62, %v6902_v53  ;;  %v6091_v54 = vsel %vm4845_vm12, %v3674_v17, %v6905_v2  ;;  %v2454_v36 = vor.u32 %v6912_v21, %v6911_v63  ;;  %v2480_v33 = vor.u32 %v6914_v22, %v6913_v6  ;;  %v6915_v7 = vld [vmem:[#allocation15_spill] sm:$0xff]  ;;  %v6917_v53 = vld [vmem:[#allocation20_spill] sm:$0xff]  ;;  %v6923_v63 = vld [vmem:[#allocation29_spill] sm:$0xff]  ;;  %4105 = vmatmul.mubr.bf16.gmra.mrb[4].mxu1 %v3678_v14 }
 0x214   : > { %v2470_v3 = vsel %vm6106_vm0, %v6916_v10, %v6915_v7  ;;  %v6918_v62 = vld [vmem:[#allocation19_spill] sm:$0xff]  ;;  %v6920_v2 = vrot.slane %v6915_v7, 4  ;;  %v6921_v46 = vld [vmem:[#allocation16_spill] sm:$0xff]  ;;  %v6924_v21 = vld [vmem:[#allocation33_spill] sm:$0xff]  ;;  %v2451_v6 = vrot.slane %v2450_v57, 4  ;;  %4108 = vmatprep.mubr.bf16.mxu1 %v3679_v23  ;;  %4137 = vmatpush3.bf16.msra.mxu1 %v4377_v52  ;;  %v7014_v49 = vcombine.low %v6038_v9, %v6047_v13 }
 0x215   : > { %v6919_v48 = vor.u32 %v6917_v53, %v6918_v62  ;;  %v2484_v26 = vor.u32 %v6922_v4, %v6921_v46  ;;  %v2495_v37 = vor.u32 %v6924_v21, %v6923_v63  ;;  %v2456_v22 = vrot.slane %v2454_v36, 4  ;;  %v6925_v7 = vld [vmem:[#allocation22_spill] sm:$0xff]  ;;  %4138 = vmatprep.subr.bf16.mxu1 %v4378_v5  ;;  %v4379_v14 = vld [vmem:[%s6617_s2 + $0xe0] sm:$0xff]   ;;  %v6934_v63 = vld [vmem:[#allocation24_spill] sm:$0xff] }
 0x216   : > { %v2481_v10 = vrot.slane %v2480_v33, 4  ;;  %v2499_v19 = vor.u32 %v6926_v45, %v6925_v7  ;;  %v2455_v57 = vsel %vm6106_vm0, %v2451_v6, %v2454_v36  ;;  %v6930_v33 = vld [vmem:[#allocation5_spill] sm:$0xff]  ;;  %v6935_v21 = vld [vmem:[#allocation26_spill] sm:$0xff] }
 0x217   : > { %v2477_v58 = vsel %vm6106_vm0, %v6920_v2, %v6919_v48  ;;  %v2486_v53 = vrot.slane %v2484_v26, 4  ;;  %v2496_v62 = vrot.slane %v2495_v37, 4  ;;  %v6927_v48 = vld [vmem:[#allocation36_spill] sm:$0xff]  ;;  %v6928_v2 = vld [vmem:[#allocation37_spill] sm:$0xff]  ;;  %v6936_v7 = vor.u32 %v6934_v63, %v6935_v21  ;;  %v6944_v21 = vld [vmem:[#allocation46_spill] sm:$0xff] }
 0x218   : > { %v6131_v60 = vcombine.low %v2470_v3, %v2477_v58  ;;  %v2510_v11 = vor.u32 %v6928_v2, %v6927_v48  ;;  %v6929_v3 = vld [vmem:[#allocation6_spill] sm:$0xff]  ;;  %v2485_v45 = vsel %vm6106_vm0, %v2481_v10, %v2484_v26  ;;  %v6932_v37 = vld [vmem:[#allocation44_spill] sm:$0xff]  ;;  %v6933_v58 = vld [vmem:[#allocation45_spill] sm:$0xff]  ;;  %v2501_v48 = vrot.slane %v2499_v19, 4  ;;  %4139 = vmatpush3.bf16.msra.mxu1 %v4378_v5 }
 0x219   : > { %v6931_v23 = vor.u32 %v6929_v3, %v6930_v33  ;;  %v2514_v46 = vor.u32 %v6933_v58, %v6932_v37  ;;  %v2492_v36 = vsel %vm6106_vm0, %v2486_v53, %v6936_v7  ;;  %v2500_v6 = vsel %vm6106_vm0, %v2496_v62, %v2499_v19  ;;  %v6937_v26 = vld [vmem:[#allocation39_spill] sm:$0xff]  ;;  %v6938_v10 = vld [vmem:[#allocation40_spill] sm:$0xff]  ;;  %v6942_v58 = vld [vmem:[#allocation50_spill] sm:$0xff]  ;;  %4140 = vmatprep.subr.bf16.mxu1 %v4379_v14 }
 0x21a   : > { %v6160_v2 = vcombine.low %v2485_v45, %v2492_v36  ;;  %v2525_v33 = vor.u32 %v6938_v10, %v6937_v26  ;;  %v6943_v53 = vld [vmem:[#allocation51_spill] sm:$0xff]  ;;  %v6945_v62 = vld [vmem:[#allocation48_spill] sm:$0xff]  ;;  %v6947_v7 = vld [vmem:[#allocation54_spill] sm:$0xff] }
 0x21b   : > { %v2462_v52 = vsel %vm6106_vm0, %v2456_v22, %v6931_v23  ;;  %v2511_v22 = vrot.slane %v2510_v11, 4  ;;  %v2516_v3 = vrot.slane %v2514_v46, 4  ;;  %v6940_v23 = vld [vmem:[#allocation27_spill] sm:$0xff]  ;;  %v2529_v63 = vor.u32 %v6943_v53, %v6942_v58  ;;  %v4380_v5 = vld [vmem:[%s6617_s2 + $0xe8] sm:$0xff]   ;;  %4109 = vmatmul.mubr.bf16.gmra.mrb[8].mxu1 %v3680_v16 }
 0x21c   : > { %v6151_v4 = vcombine.low %v2455_v57, %v2462_v52  ;;  %v6939_v57 = vld [vmem:[#allocation28_spill] sm:$0xff]  ;;  %v2540_v19 = vor.u32 %v6945_v62, %v6944_v21  ;;  %v6946_v45 = vld [vmem:[#allocation55_spill] sm:$0xff]  ;;  %v6949_v10 = vld [vmem:[#allocation34_spill] sm:$0xff]  ;;  %4112 = vmatprep.mubr.bf16.mxu1 %v3681_v28  ;;  %4141 = vmatpush3.bf16.msra.mxu1 %v4379_v14  ;;  %v6959_v16 = vor.u32 %v6957_v15, %v6958_v42 }
 0x21d   : > { %v6941_v52 = vor.u32 %v6939_v57, %v6940_v23  ;;  %v2544_v11 = vor.u32 %v6947_v7, %v6946_v45  ;;  %v2515_v26 = vsel %vm6106_vm0, %v2511_v22, %v2514_v46  ;;  %v2531_v53 = vrot.slane %v2529_v63, 4  ;;  %v6951_v46 = vld [vmem:[#allocation70_spill] sm:$0xff]  ;;  %v6952_v22 = vld [vmem:[#allocation72_spill] sm:$0xff]  ;;  %v6954_v7 = vld [vmem:[#allocation63_spill] sm:$0xff]  ;;  %4142 = vmatprep.subr.bf16.mxu1 %v4380_v5 }
 0x21e   : > { %v2541_v21 = vrot.slane %v2540_v19, 4  ;;  %v6953_v45 = vld [vmem:[#allocation62_spill] sm:$0xff]  ;;  %v6202_v19 = vrot.slane %v1459_v39, 6  ;;  %v4381_v39 = vld [vmem:[%s6617_s2 + $0xf0] sm:$0xff]   ;;  %v6969_v42 = vld [vmem:[#allocation69_spill] sm:$0xff] }
 0x21f   : > { %v2507_v37 = vsel %vm6106_vm0, %v2501_v48, %v6941_v52  ;;  %v6948_v48 = vld [vmem:[#allocation35_spill] sm:$0xff]  ;;  %v2526_v52 = vrot.slane %v2525_v33, 4  ;;  %v2546_v62 = vrot.slane %v2544_v11, 4  ;;  %v6956_v33 = vld [vmem:[#allocation78_spill] sm:$0xff] }
 0x220   : > { %v6178_v36 = vcombine.low %v2500_v6, %v2507_v37  ;;  %v6950_v57 = vor.u32 %v6948_v48, %v6949_v10  ;;  %v2555_v37 = vor.u32 %v6952_v22, %v6951_v46  ;;  %v2559_v48 = vor.u32 %v6954_v7, %v6953_v45  ;;  %v6963_v46 = vld [vmem:[#allocation85_spill] sm:$0xff]  ;;  %v6965_v22 = vld [vmem:[#allocation80_spill] sm:$0xff]  ;;  %4143 = vmatpush3.bf16.msra.mxu1 %v4380_v5 }
 0x221   : > { %v2530_v6 = vsel %vm6106_vm0, %v2526_v52, %v2529_v63  ;;  %v2537_v63 = vsel %vm6106_vm0, %v2531_v53, %v6959_v16  ;;  %v2545_v10 = vsel %vm6106_vm0, %v2541_v21, %v2544_v11  ;;  %v6964_v11 = vld [vmem:[#allocation86_spill] sm:$0xff]  ;;  %v6966_v45 = vld [vmem:[#allocation81_spill] sm:$0xff]  ;;  %4144 = vmatprep.subr.bf16.mxu1 %v4381_v39  ;;  %v6979_v5 = vld [vmem:[#allocation76_spill] sm:$0xff] }
 0x222   : > { %v2522_v23 = vsel %vm6106_vm0, %v2516_v3, %v6950_v57  ;;  %v6955_v3 = vld [vmem:[#allocation77_spill] sm:$0xff]  ;;  %v6222_v34 = vcombine.low %v2530_v6, %v2537_v63  ;;  %v2556_v28 = vrot.slane %v2555_v37, 4  ;;  %v2561_v14 = vrot.slane %v2559_v48, 4  ;;  %v6970_v6 = vld [vmem:[#allocation68_spill] sm:$0xff]  ;;  %v6972_v63 = vld [vmem:[#allocation87_spill] sm:$0xff] }
 0x223   : > { %v6187_v58 = vcombine.low %v2515_v26, %v2522_v23  ;;  %v2570_v26 = vor.u32 %v6956_v33, %v6955_v3  ;;  %v6960_v57 = vld [vmem:[#allocation65_spill] sm:$0xff]  ;;  %v6961_v23 = vld [vmem:[#allocation64_spill] sm:$0xff]  ;;  %v2574_v21 = vor.u32 %v6964_v11, %v6963_v46  ;;  %v2585_v7 = vor.u32 %v6966_v45, %v6965_v22  ;;  %4113 = vmatmul.mubr.bf16.gmra.mrb[12].mxu1 %v3682_v56 }
 0x224   : > { %v6962_v52 = vor.u32 %v6960_v57, %v6961_v23  ;;  %v6967_v3 = vld [vmem:[#allocation89_spill] sm:$0xff]  ;;  %v2560_v15 = vsel %vm6106_vm0, %v2556_v28, %v2559_v48  ;;  %v6971_v16 = vor.u32 %v6969_v42, %v6970_v6  ;;  %v6974_v57 = vld [vmem:[#allocation95_spill] sm:$0xff]  ;;  %v6975_v23 = vld [vmem:[#allocation96_spill] sm:$0xff]  ;;  %4116 = vmatprep.mubr.bf16.mxu1 %v3683_v35  ;;  %4145 = vmatpush3.bf16.msra.mxu1 %v4381_v39 }
 0x225   : > { %v2571_v53 = vrot.slane %v2570_v26, 4  ;;  %v6973_v26 = vld [vmem:[#allocation88_spill] sm:$0xff]  ;;  %v2576_v11 = vrot.slane %v2574_v21, 4  ;;  %v2586_v48 = vrot.slane %v2585_v7, 4  ;;  %v6978_v6 = vld [vmem:[#allocation75_spill] sm:$0xff] }
 0x226   : > { %v2552_v32 = vsel %vm6106_vm0, %v2546_v62, %v6962_v52  ;;  %v6968_v62 = vld [vmem:[#allocation91_spill] sm:$0xff]  ;;  %v2567_v37 = vsel %vm6106_vm0, %v2561_v14, %v6971_v16  ;;  %v2604_v52 = vor.u32 %v6975_v23, %v6974_v57  ;;  %v4382_v28 = vld [vmem:[%s6617_s2 + $0xf8] sm:$0xff]   ;;  %v6985_v23 = vld [vmem:[#allocation97_spill] sm:$0xff] }
 0x227   : > { %v6224_v55 = vcombine.low %v2545_v10, %v2552_v32  ;;  %v2589_v33 = vor.u32 %v6968_v62, %v6967_v3  ;;  %v2600_v10 = vor.u32 %v6973_v26, %v6972_v63  ;;  %v6243_v32 = vcombine.low %v2560_v15, %v2567_v37  ;;  %v6976_v3 = vld [vmem:[#allocation105_spill] sm:$0xff]  ;;  %v6977_v62 = vld [vmem:[#allocation106_spill] sm:$0xff]  ;;  %v6982_v7 = vld [vmem:[#allocation100_spill] sm:$0xff]  ;;  %4146 = vmatprep.subr.bf16.mxu1 %v4382_v28 }
 0x228   : > { %v2575_v46 = vsel %vm6106_vm0, %v2571_v53, %v2574_v21  ;;  %v2606_v45 = vrot.slane %v2604_v52, 4  ;;  %v2615_v42 = vor.u32 %v6977_v62, %v6976_v3  ;;  %v6980_v15 = vor.u32 %v6978_v6, %v6979_v5  ;;  %v6981_v21 = vld [vmem:[#allocation99_spill] sm:$0xff]  ;;  %v6983_v63 = vld [vmem:[#allocation109_spill] sm:$0xff]  ;;  %v6984_v26 = vld [vmem:[#allocation110_spill] sm:$0xff]  ;;  %4147 = vmatpush3.bf16.msra.mxu1 %v4382_v28 }
 0x229   : > { %v2591_v14 = vrot.slane %v2589_v33, 4  ;;  %v2601_v22 = vrot.slane %v2600_v10, 4  ;;  %v2590_v53 = vsel %vm6106_vm0, %v2586_v48, %v2589_v33  ;;  %v2619_v37 = vor.u32 %v6982_v7, %v6981_v21  ;;  %v6986_v3 = vld [vmem:[#allocation98_spill] sm:$0xff]  ;;  %v6988_v48 = vld [vmem:[#allocation101_spill] sm:$0xff]  ;;  %v6992_v21 = vld [vmem:[#allocation115_spill] sm:$0xff] }
 0x22a   : > { %v2582_v16 = vsel %vm6106_vm0, %v2576_v11, %v6980_v15  ;;  %v2630_v57 = vor.u32 %v6984_v26, %v6983_v63  ;;  %v6987_v62 = vor.u32 %v6985_v23, %v6986_v3  ;;  %v6989_v6 = vld [vmem:[#allocation102_spill] sm:$0xff]  ;;  %v2616_v56 = vrot.slane %v2615_v42, 4  ;;  %v6994_v7 = vld [vmem:[#allocation112_spill] sm:$0xff]  ;;  %v6996_v23 = vld [vmem:[#allocation119_spill] sm:$0xff] }
 0x22b   : > { %v3707_v10 = vcombine.low %v2575_v46, %v2582_v16  ;;  %v2605_v33 = vsel %vm6106_vm0, %v2601_v22, %v2604_v52  ;;  %v6990_v5 = vor.u32 %v6988_v48, %v6989_v6  ;;  %v2621_v46 = vrot.slane %v2619_v37, 4  ;;  %v6991_v16 = vld [vmem:[#allocation114_spill] sm:$0xff]  ;;  %v6993_v22 = vld [vmem:[#allocation111_spill] sm:$0xff]  ;;  %v6998_v35 = vld [vmem:[#allocation104_spill] sm:$0xff]  ;;  %4117 = vmatmul.mubr.bf16.gmra.mrb[16].mxu1 %v3684_v59 }
 0x22c   : > { %v2597_v11 = vsel %vm6106_vm0, %v2591_v14, %v6987_v62  ;;  %v2631_v14 = vrot.slane %v2630_v57, 4  ;;  %v2634_v52 = vor.u32 %v6992_v21, %v6991_v16  ;;  %v2645_v63 = vor.u32 %v6994_v7, %v6993_v22  ;;  %v6995_v26 = vld [vmem:[#allocation118_spill] sm:$0xff]  ;;  %v7001_v57 = vld [vmem:[#allocation117_spill] sm:$0xff]  ;;  %v7002_v62 = vld [vmem:[#allocation123_spill] sm:$0xff] }
 0x22d   : > { %v2612_v15 = vsel %vm6106_vm0, %v2606_v45, %v6990_v5  ;;  %v3708_v18 = vcombine.low %v2590_v53, %v2597_v11  ;;  %v2649_v45 = vor.u32 %v6996_v23, %v6995_v26  ;;  %v2620_v40 = vsel %vm6106_vm0, %v2616_v56, %v2619_v37  ;;  %v7000_v53 = vld [vmem:[#allocation116_spill] sm:$0xff]  ;;  %v7003_v11 = vld [vmem:[#allocation122_spill] sm:$0xff]  ;;  %v7007_v28 = vld [vmem:[#allocation125_spill] sm:$0xff] }
 0x22e   : > { %v3709_v50 = vcombine.low %v2605_v33, %v2612_v15  ;;  %v6999_v39 = vor.u32 %v6997_v43, %v6998_v35  ;;  %v2660_v3 = vor.u32 %v7001_v57, %v7000_v53  ;;  %v2664_v33 = vor.u32 %v7003_v11, %v7002_v62  ;;  %v7005_v22 = vld [vmem:[#allocation108_spill] sm:$0xff] }
 0x22f   : > { %v2635_v6 = vsel %vm6106_vm0, %v2631_v14, %v2634_v52  ;;  %v2636_v5 = vrot.slane %v2634_v52, 4  ;;  %v2646_v15 = vrot.slane %v2645_v63, 4  ;;  %v2651_v37 = vrot.slane %v2649_v45, 4  ;;  %v7008_v63 = vld [vmem:[#allocation124_spill] sm:$0xff] }
 0x230   : > { %v2627_v42 = vsel %vm6106_vm0, %v2621_v46, %v6999_v39  ;;  %v2661_v56 = vrot.slane %v2660_v3, 4  ;;  %v2666_v16 = vrot.slane %v2664_v33, 4  ;;  %v2675_v21 = vor.u32 %v6202_v19, %v5831_v25  ;;  %v7004_v46 = vld [vmem:[#allocation107_spill] sm:$0xff]  ;;  %v4383_v3 = vld [vmem:[%s6620_s5] sm:$0xff]  }
 0x231   : > { %v3710_v48 = vcombine.low %v2620_v40, %v2627_v42  ;;  %v7006_v7 = vor.u32 %v7004_v46, %v7005_v22  ;;  %v2650_v23 = vsel %vm6106_vm0, %v2646_v15, %v2649_v45  ;;  %v2679_v14 = vor.u32 %v5776_v44, %v5774_v24  ;;  %v4386_v46 = vld [vmem:[%s6620_s5 + $0x18] sm:$0xff]   ;;  %v4387_v22 = vld [vmem:[%s6620_s5 + $0x20] sm:$0xff]  }
 0x232   : > { %v7009_v40 = vor.u32 %v7007_v28, %v7008_v63  ;;  %v2665_v25 = vsel %vm6106_vm0, %v2661_v56, %v2664_v33  ;;  %v7010_v19 = vor.u32 %v5785_v51, %v5792_v31  ;;  %v2676_v45 = vrot.slane %v2675_v21, 4  ;;  %v4385_v21 = vld [vmem:[%s6620_s5 + $0x10] sm:$0xff]   ;;  %v6451_v63 = vld [vmem:[%s6619_s4] sm:$0xff] }
 0x233   : > { %v2642_v26 = vsel %vm6106_vm0, %v2636_v5, %v7006_v7  ;;  %v2681_v39 = vrot.slane %v2679_v14, 4  ;;  %v7011_v42 = vcombine.low %v6003_v61, %v6010_v20  ;;  %v7012_v51 = vor.u32 %v5818_v1, %v5816_v30  ;;  %v4384_v5 = vld [vmem:[%s6620_s5 + $0x8] sm:$0xff]  }
 0x234   : > { %v3711_v52 = vcombine.low %v2635_v6, %v2642_v26  ;;  %v2657_v43 = vsel %vm6106_vm0, %v2651_v37, %v7009_v40  ;;  %v2672_v35 = vsel %vm6106_vm0, %v2666_v16, %v7010_v19  ;;  %v2680_v53 = vsel %vm6106_vm0, %v2676_v45, %v2679_v14  ;;  %v4388_v7 = vld [vmem:[%s6620_s5 + $0x28] sm:$0xff]   ;;  %v4389_v26 = vld [vmem:[%s6620_s5 + $0x30] sm:$0xff]  }
 0x235   : > { %v3712_v24 = vcombine.low %v2650_v23, %v2657_v43  ;;  %v3713_v44 = vcombine.low %v2665_v25, %v2672_v35  ;;  %4120 = vmatprep.mubr.bf16.mxu1 %v7011_v42  ;;  %v2687_v31 = vsel %vm6106_vm0, %v2681_v39, %v7012_v51  ;;  %v7015_v59 = vcombine.low %v6055_v47, %v6062_v0  ;;  %v4390_v23 = vld [vmem:[%s6620_s5 + $0x38] sm:$0xff]   ;;  %v6457_v25 = vld [vmem:[%s6619_s4 + $0x8] sm:$0xff] }
 0x236   : > { %v3714_v57 = vcombine.low %v2680_v53, %v2687_v31  ;;  %4121 = vmatmul.mubr.bf16.gmra.mrb[20].mxu1 %v7013_v12  ;;  %v7016_v61 = vcombine.low %v6074_v27, %v6081_v8  ;;  %v7017_v30 = vcombine.low %v6091_v54, %v6098_v38  ;;  %v4457_v62 = vmov 0.0  }
 0x237   : > { %4124 = vmatprep.mubr.bf16.mxu1 %v7014_v49  ;;  %4180 = vmatprep.subr.bf16.mxu0 %v4457_v62 }
 0x238   : > { %4181 = vmatpush3.bf16.msra.mxu0 %v4383_v3  ;;  %4196 = vmatprep.mubr.msk.bf16.mxu0 %vm4458_vm1, %v4457_v62 }
 0x239   : > { %4182 = vmatprep.subr.bf16.mxu0 %v4457_v62 }
 0x23c   : > { %4183 = vmatpush3.bf16.msra.mxu0 %v4384_v5 }
 0x23d   : > { %4184 = vmatprep.subr.bf16.mxu0 %v4457_v62 }
 0x23e   : > { %4125 = vmatmul.mubr.bf16.gmra.mrb[24].mxu1 %v7015_v59 }
 0x23f   : > { %4128 = vmatprep.mubr.bf16.mxu1 %v7016_v61 }
 0x240   : > { %4185 = vmatpush3.bf16.msra.mxu0 %v4385_v21 }
 0x241   : > { %4186 = vmatprep.subr.bf16.mxu0 %v4457_v62 }
 0x244   : > { %4187 = vmatpush3.bf16.msra.mxu0 %v4386_v46 }
 0x245   : > { %4188 = vmatprep.subr.bf16.mxu0 %v4457_v62 }
 0x246   : > { %4129 = vmatmul.mubr.bf16.gmra.mrb[28].mxu1 %v7017_v30 }
 0x247   : > { %4148 = vmatprep.mubr.bf16.mxu1 %v6151_v4 }
 0x248   : > { %4189 = vmatpush3.bf16.msra.mxu0 %v4387_v22 }
 0x249   : > { %4190 = vmatprep.subr.bf16.mxu0 %v4457_v62 }
 0x24c   : > { %4191 = vmatpush3.bf16.msra.mxu0 %v4388_v7 }
 0x24d   : > { %4192 = vmatprep.subr.bf16.mxu0 %v4457_v62 }
 0x24e   : > { %4149 = vmatmul.mubr.bf16.vlgmr.msra.gmra.mrb[0].mxu1 %v6131_v60 }
 0x24f   : > { %4152 = vmatprep.mubr.bf16.mxu1 %v6160_v2 }
 0x250   : > { %4193 = vmatpush3.bf16.msra.mxu0 %v4389_v26 }
 0x251   : > { %4194 = vmatprep.subr.bf16.mxu0 %v4457_v62 }
 0x254   : > { %4195 = vmatpush3.bf16.msra.mxu0 %v4390_v23 }
 0x256   : > { %4153 = vmatmul.mubr.bf16.gmra.mrb[4].mxu1 %v6178_v36 }
 0x257   : > { %4156 = vmatprep.mubr.bf16.mxu1 %v6187_v58 }
 0x25e   : > { %4157 = vmatmul.mubr.bf16.gmra.mrb[8].mxu1 %v6222_v34 }
 0x25f   : > { %4160 = vmatprep.mubr.bf16.mxu1 %v6224_v55 }
 0x266   : > { %4161 = vmatmul.mubr.bf16.gmra.mrb[12].mxu1 %v6243_v32 }
 0x267   : > { %4164 = vmatprep.mubr.bf16.mxu1 %v3707_v10 }
 0x26d   : > { %v6359_v1 = vpop.f32.mrb[48].mxu0 }
 0x26e   : > { %4165 = vmatmul.mubr.bf16.gmra.mrb[16].mxu1 %v3708_v18  ;;  %v6361_v20 = vpop.f32.mrb[49].mxu0 }
 0x26f   : > { %4168 = vmatprep.mubr.bf16.mxu1 %v3709_v50  ;;  %v6363_v29 = vpop.f32.mrb[50].mxu0 }
 0x270   : > { %v6365_v41 = vpop.f32.mrb[51].mxu0 }
 0x276   : > { %4169 = vmatmul.mubr.bf16.gmra.mrb[20].mxu1 %v3710_v48 }
 0x277   : > { %4172 = vmatprep.mubr.bf16.mxu1 %v3711_v52 }
 0x27e   : > { %4173 = vmatmul.mubr.bf16.gmra.mrb[24].mxu1 %v3712_v24 }
 0x27f   : > { %4176 = vmatprep.mubr.bf16.mxu1 %v3713_v44  ;;  %v6367_v9 = vpop.f32.mrb[52].mxu0 }
 0x280   : > { %v6369_v13 = vpop.f32.mrb[53].mxu0 }
 0x281   : > { %v6371_v47 = vpop.f32.mrb[54].mxu0 }
 0x282   : > { %v6373_v0 = vpop.f32.mrb[55].mxu0 }
 0x286   : > { %4177 = vmatmul.mubr.bf16.gmra.mrb[28].mxu1 %v3714_v57 }
 0x292   : > { %v6375_v60 = vpop.f32.mrb[56].mxu0 }
 0x293   : > { %v6377_v27 = vpop.f32.mrb[57].mxu0 }
 0x294   : > { %v6379_v8 = vpop.f32.mrb[58].mxu0 }
 0x295   : > { %v6381_v54 = vpop.f32.mrb[59].mxu0 }
 0x2a0   : > { %v6383_v38 = vpop.f32.mrb[60].mxu0 }
 0x2a1   : > { %v6385_v17 = vpop.f32.mrb[61].mxu0 }
 0x2a2   : > { %v6387_v4 = vpop.f32.mrb[62].mxu0 }
 0x2a3   : > { %v6389_v2 = vpop.f32.mrb[63].mxu0 }
 0x2b0   : > { %v6391_v36 = vpop.f32.mrb[64].mxu0 }
 0x2b1   : > { %v6393_v58 = vpop.f32.mrb[65].mxu0 }
 0x2b2   : > { %v6395_v34 = vpop.f32.mrb[66].mxu0 }
 0x2b3   : > { %v6397_v55 = vpop.f32.mrb[67].mxu0 }
 0x2c1   : > { %v6399_v32 = vpop.f32.mrb[68].mxu0 }
 0x2c2   : > { %v6401_v10 = vpop.f32.mrb[69].mxu0 }
 0x2c3   : > { %v6403_v18 = vpop.f32.mrb[70].mxu0 }
 0x2c4   : > { %v6405_v50 = vpop.f32.mrb[71].mxu0 }
 0x2d2   : > { %v6410_v11 = vpop.f32.mrb[72].mxu0 }
 0x2d3   : > { %v6412_v33 = vpop.f32.mrb[73].mxu0 }
 0x2d4   : > { %v6414_v48 = vpop.f32.mrb[74].mxu0 }
 0x2d5   : > { %v6416_v6 = vpop.f32.mrb[75].mxu0 }
 0x2da   : > { %v6421_v15 = vpop.f32.mrb[76].mxu0 }
 0x2db   : > { %v6423_v37 = vpop.f32.mrb[77].mxu0 }
 0x2dc   : > { %v6425_v56 = vpop.f32.mrb[78].mxu0 }
 0x2dd   : > { %v6427_v16 = vpop.f32.mrb[79].mxu0 }
 0x321   : > { %v4150_v14 = vpop.f32.mrb[0].mxu1 }
 0x322   : > { %v4200_v52 = vadd.f32 %v4150_v14, %v6359_v1  ;;  %v2850_v28 = vpop.f32.mrb[1].mxu1 }
 0x323   : > { %v4201_v40 = vadd.f32 %v2850_v28, %v6361_v20  ;;  %v4151_v43 = vpop.f32.mrb[2].mxu1 }
 0x324   : > { %v4202_v19 = vadd.f32 %v4151_v43, %v6363_v29  ;;  %v2853_v35 = vpop.f32.mrb[3].mxu1  ;;  %v3013_v44 = vadd.f32 %v4200_v52, %v6451_v63 }
 0x325   : > { %v4203_v24 = vadd.f32 %v2853_v35, %v6365_v41  ;;  %v3011_v39 = vadd.f32 %v4201_v40, %v6451_v63  ;;  %v6477_v40 = vld [vmem:[%s6618_s3] ss:$0 sm:$0xff] }
 0x326   : > { %v3014_v45 = vadd.f32 %v4202_v19, %v6457_v25 }
 0x327   : > { %v3012_v42 = vadd.f32 %v4203_v24, %v6457_v25 }
 0x328   : > { %v3050_v53 = vmax.f32 %v3013_v44, %v3014_v45 }
 0x329   : > { %v3043_v51 = vmax.f32 %v3011_v39, %v3012_v42  ;;  %v4154_v31 = vpop.f32.mrb[4].mxu1 }
 0x32a   : > { %v3051_v57 = vrot.slane %v3050_v53, 4  ;;  %v4204_v12 = vadd.f32 %v4154_v31, %v6367_v9  ;;  %v2866_v49 = vpop.f32.mrb[5].mxu1 }
 0x32b   : > { %v3044_v59 = vrot.slane %v3043_v51, 4  ;;  %v4205_v61 = vadd.f32 %v2866_v49, %v6369_v13  ;;  %v4155_v30 = vpop.f32.mrb[6].mxu1 }
 0x32c   : > { %v3052_v1 = vmax.f32 %v3050_v53, %v3051_v57  ;;  %v4206_v20 = vadd.f32 %v4155_v30, %v6371_v47  ;;  %v2869_v29 = vpop.f32.mrb[7].mxu1  ;;  %v3017_v5 = vadd.f32 %v4204_v12, %v6451_v63 }
 0x32d   : > { %v3045_v41 = vmax.f32 %v3043_v51, %v3044_v59  ;;  %v4207_v3 = vadd.f32 %v2869_v29, %v6373_v0  ;;  %v3015_v9 = vadd.f32 %v4205_v61, %v6451_v63 }
 0x32e   : > { %v3053_v62 = vrot.slane %v3052_v1, 2  ;;  %v3018_v21 = vadd.f32 %v4206_v20, %v6457_v25 }
 0x32f   : > { %v3046_v46 = vrot.slane %v3045_v41, 2  ;;  %v3016_v22 = vadd.f32 %v4207_v3, %v6457_v25 }
 0x330   : > { %v3054_v7 = vmax.f32 %v3052_v1, %v3053_v62  ;;  %v3064_v13 = vmax.f32 %v3017_v5, %v3018_v21 }
 0x331   : > { %v3047_v26 = vmax.f32 %v3045_v41, %v3046_v46  ;;  %v3057_v23 = vmax.f32 %v3015_v9, %v3016_v22  ;;  %v4158_v14 = vpop.f32.mrb[8].mxu1 }
 0x332   : > { %v3055_v47 = vrot.slane %v3054_v7, 1  ;;  %v3065_v52 = vrot.slane %v3064_v13, 4  ;;  %v4208_v28 = vadd.f32 %v4158_v14, %v6375_v60  ;;  %v2882_v0 = vpop.f32.mrb[9].mxu1 }
 0x333   : > { %v3048_v43 = vrot.slane %v3047_v26, 1  ;;  %v3058_v19 = vrot.slane %v3057_v23, 4  ;;  %v4209_v35 = vadd.f32 %v2882_v0, %v6377_v27  ;;  %v4159_v24 = vpop.f32.mrb[10].mxu1 }
 0x334   : > { %v3056_v44 = vmax.f32 %v3054_v7, %v3055_v47  ;;  %v3066_v45 = vmax.f32 %v3064_v13, %v3065_v52  ;;  %v4210_v39 = vadd.f32 %v4159_v24, %v6379_v8  ;;  %v2885_v42 = vpop.f32.mrb[11].mxu1  ;;  %v3021_v12 = vadd.f32 %v4208_v28, %v6451_v63 }
 0x335   : > { %v3049_v53 = vmax.f32 %v3047_v26, %v3048_v43  ;;  %v3059_v51 = vmax.f32 %v3057_v23, %v3058_v19  ;;  %v4211_v60 = vadd.f32 %v2885_v42, %v6381_v54  ;;  %v3019_v61 = vadd.f32 %v4209_v35, %v6451_v63 }
 0x336   : > { %v3163_v31 = vadd.f32 %v6477_v40, %v3056_v44  ;;  %v3067_v57 = vrot.slane %v3066_v45, 2  ;;  %v3022_v49 = vadd.f32 %v4210_v39, %v6457_v25 }
 0x337   : > { %v3162_v59 = vadd.f32 %v6477_v40, %v3049_v53  ;;  %v3060_v27 = vrot.slane %v3059_v51, 2  ;;  %v3020_v30 = vadd.f32 %v4211_v60, %v6457_v25 }
 0x338   : > { %v3179_v8 = vmax.f32 %v3163_v31, 0.0  ;;  %v3068_v1 = vmax.f32 %v3066_v45, %v3067_v57  ;;  %v3078_v20 = vmax.f32 %v3021_v12, %v3022_v49 }
 0x339   : > { %v3178_v29 = vmax.f32 %v3162_v59, 0.0  ;;  %v3061_v41 = vmax.f32 %v3059_v51, %v3060_v27  ;;  %v3071_v54 = vmax.f32 %v3019_v61, %v3020_v30  ;;  %v4162_v3 = vpop.f32.mrb[12].mxu1 }
 0x33a   : > { %v3195_v62 = vpack.c.bf16 %v3179_v8, %v3179_v8  ;;  %v3069_v5 = vrot.slane %v3068_v1, 1  ;;  %v3079_v21 = vrot.slane %v3078_v20, 4  ;;  %v4212_v46 = vadd.f32 %v4162_v3, %v6383_v38  ;;  %v2898_v9 = vpop.f32.mrb[13].mxu1 }
 0x33b   : > { %v3194_v22 = vpack.c.bf16 %v3178_v29, %v3178_v29  ;;  %v3062_v7 = vrot.slane %v3061_v41, 1  ;;  %v3072_v13 = vrot.slane %v3071_v54, 4  ;;  %v4213_v26 = vadd.f32 %v2898_v9, %v6385_v17  ;;  %v4163_v23 = vpop.f32.mrb[14].mxu1 }
 0x33c   : > { %v3250_v14 = vunpack.c.l.b16 %v3195_v62  ;;  %v3070_v47 = vmax.f32 %v3068_v1, %v3069_v5  ;;  %v3080_v52 = vmax.f32 %v3078_v20, %v3079_v21  ;;  %v2901_v28 = vpop.f32.mrb[15].mxu1  ;;  %v4214_v44 = vadd.f32 %v4163_v23, %v6387_v4 }
 0x33d   : > { %v3249_v0 = vunpack.c.l.b16 %v3194_v22  ;;  %v3063_v43 = vmax.f32 %v3061_v41, %v3062_v7  ;;  %v3073_v19 = vmax.f32 %v3071_v54, %v3072_v13  ;;  %v3025_v17 = vadd.f32 %v4212_v46, %v6451_v63 }
 0x33e   : > { %v3265_v35 = vrot.slane %v3250_v14, 7  ;;  %v3165_v24 = vadd.f32 %v6477_v40, %v3070_v47  ;;  %v3081_v38 = vrot.slane %v3080_v52, 2  ;;  %v4215_v42 = vadd.f32 %v2901_v28, %v6389_v2 }
 0x33f   : > { %v3164_v45 = vadd.f32 %v6477_v40, %v3063_v43  ;;  %v3074_v39 = vrot.slane %v3073_v19, 2  ;;  %v3026_v31 = vadd.f32 %v4214_v44, %v6457_v25  ;;  %v3023_v49 = vadd.f32 %v4213_v26, %v6451_v63 }
 0x340   : > { %v3267_v53 = vsel %vm3266_vm2, %v3265_v35, %v3249_v0  ;;  %v3181_v51 = vmax.f32 %v3165_v24, 0.0  ;;  %v3082_v60 = vmax.f32 %v3080_v52, %v3081_v38  ;;  %v3024_v59 = vadd.f32 %v4215_v42, %v6457_v25 }
 0x341   : > { %v3180_v57 = vmax.f32 %v3164_v45, 0.0  ;;  %v3075_v12 = vmax.f32 %v3073_v19, %v3074_v39  ;;  %v4166_v4 = vpop.f32.mrb[16].mxu1  ;;  %v3092_v30 = vmax.f32 %v3025_v17, %v3026_v31 }
 0x342   : > { %v3197_v27 = vpack.c.bf16 %v3181_v51, %v3181_v51  ;;  %v3083_v61 = vrot.slane %v3082_v60, 1  ;;  %v4216_v8 = vadd.f32 %v4166_v4, %v6391_v36  ;;  %v2914_v1 = vpop.f32.mrb[17].mxu1  ;;  %v3085_v29 = vmax.f32 %v3023_v49, %v3024_v59 }
 0x343   : > { %v3196_v2 = vpack.c.bf16 %v3180_v57, %v3180_v57  ;;  %v3076_v20 = vrot.slane %v3075_v12, 1  ;;  %v4217_v41 = vadd.f32 %v2914_v1, %v6393_v58  ;;  %v4167_v54 = vpop.f32.mrb[18].mxu1  ;;  %v3093_v5 = vrot.slane %v3092_v30, 4 }
 0x344   : > { %v3252_v3 = vunpack.c.l.b16 %v3197_v27  ;;  %v3084_v62 = vmax.f32 %v3082_v60, %v3083_v61  ;;  %v2917_v21 = vpop.f32.mrb[19].mxu1  ;;  %v3086_v22 = vrot.slane %v3085_v29, 4  ;;  %v3029_v7 = vadd.f32 %v4216_v8, %v6451_v63 }
 0x345   : > { %v3251_v46 = vunpack.c.l.b16 %v3196_v2  ;;  %v3077_v9 = vmax.f32 %v3075_v12, %v3076_v20  ;;  %v3094_v36 = vmax.f32 %v3092_v30, %v3093_v5  ;;  %v3027_v26 = vadd.f32 %v4217_v41, %v6451_v63 }
 0x346   : > { %v3167_v13 = vadd.f32 %v6477_v40, %v3084_v62  ;;  %v4218_v23 = vadd.f32 %v4167_v54, %v6395_v34  ;;  %v3087_v47 = vmax.f32 %v3085_v29, %v3086_v22  ;;  %v4219_v52 = vadd.f32 %v2917_v21, %v6397_v55 }
 0x347   : > { %v3268_v14 = vrot.slane %v3251_v46, 6  ;;  %v3166_v58 = vadd.f32 %v6477_v40, %v3077_v9  ;;  %v3271_v28 = vrot.slane %v3252_v3, 5  ;;  %v3095_v43 = vrot.slane %v3094_v36, 2 }
 0x348   : > { %v3183_v0 = vmax.f32 %v3167_v13, 0.0  ;;  %v3030_v19 = vadd.f32 %v4218_v23, %v6457_v25  ;;  %v3088_v38 = vrot.slane %v3087_v47, 2  ;;  %v3028_v44 = vadd.f32 %v4219_v52, %v6457_v25 }
 0x349   : > { %v3270_v35 = vsel %vm3269_vm3, %v3268_v14, %v3267_v53  ;;  %v3182_v24 = vmax.f32 %v3166_v58, 0.0  ;;  %v4170_v45 = vpop.f32.mrb[20].mxu1  ;;  %v3096_v17 = vmax.f32 %v3094_v36, %v3095_v43 }
 0x34a   : > { %v3199_v39 = vpack.c.bf16 %v3183_v0, %v3183_v0  ;;  %v3273_v34 = vsel %vm3272_vm4, %v3271_v28, %v3270_v35  ;;  %v3106_v42 = vmax.f32 %v3029_v7, %v3030_v19  ;;  %v2930_v51 = vpop.f32.mrb[21].mxu1  ;;  %v3089_v55 = vmax.f32 %v3087_v47, %v3088_v38 }
 0x34b   : > { %v3198_v60 = vpack.c.bf16 %v3182_v24, %v3182_v24  ;;  %v3099_v31 = vmax.f32 %v3027_v26, %v3028_v44  ;;  %v4220_v57 = vadd.f32 %v4170_v45, %v6399_v32  ;;  %v4171_v12 = vpop.f32.mrb[22].mxu1  ;;  %v3097_v59 = vrot.slane %v3096_v17, 1 }
 0x34c   : > { %v3254_v49 = vunpack.c.l.b16 %v3199_v39  ;;  %v3107_v53 = vrot.slane %v3106_v42, 4  ;;  %v4221_v4 = vadd.f32 %v2930_v51, %v6401_v10  ;;  %v2933_v27 = vpop.f32.mrb[23].mxu1  ;;  %v3090_v30 = vrot.slane %v3089_v55, 1 }
 0x34d   : > { %v3253_v61 = vunpack.c.l.b16 %v3198_v60  ;;  %v3100_v8 = vrot.slane %v3099_v31, 4  ;;  %v3098_v2 = vmax.f32 %v3096_v17, %v3097_v59  ;;  %v3033_v29 = vadd.f32 %v4220_v57, %v6451_v63 }
 0x34e   : > { %v6513_v1 = vrot.slane %v3254_v49, 3  ;;  %v3108_v20 = vmax.f32 %v3106_v42, %v3107_v53  ;;  %v3091_v54 = vmax.f32 %v3089_v55, %v3090_v30  ;;  %v4222_v3 = vadd.f32 %v4171_v12, %v6403_v18 }
 0x34f   : > { %v3274_v41 = vrot.slane %v3253_v61, 4  ;;  %v3101_v32 = vmax.f32 %v3099_v31, %v3100_v8  ;;  %v3169_v62 = vadd.f32 %v6477_v40, %v3098_v2  ;;  %v3031_v10 = vadd.f32 %v4221_v4, %v6451_v63 }
 0x350   : > { %v3109_v5 = vrot.slane %v3108_v20, 2  ;;  %v4223_v21 = vadd.f32 %v2933_v27, %v6405_v50  ;;  %v3168_v9 = vadd.f32 %v6477_v40, %v3091_v54  ;;  %v3034_v7 = vadd.f32 %v4222_v3, %v6457_v25 }
 0x351   : > { %v6521_v46 = vsel %vm3275_vm5, %v3274_v41, %v3273_v34  ;;  %v3102_v22 = vrot.slane %v3101_v32, 2  ;;  %v4174_v13 = vpop.f32.mrb[24].mxu1  ;;  %v3185_v36 = vmax.f32 %v3169_v62, 0.0 }
 0x352   : > { %v3110_v26 = vmax.f32 %v3108_v20, %v3109_v5  ;;  %v3032_v18 = vadd.f32 %v4223_v21, %v6457_v25  ;;  %v4224_v23 = vadd.f32 %v4174_v13, %v6410_v11  ;;  %v2946_v14 = vpop.f32.mrb[25].mxu1  ;;  %v3184_v58 = vmax.f32 %v3168_v9, 0.0 }
 0x353   : > { %v3103_v47 = vmax.f32 %v3101_v32, %v3102_v22  ;;  %v3120_v52 = vmax.f32 %v3033_v29, %v3034_v7  ;;  %v4225_v50 = vadd.f32 %v2946_v14, %v6412_v33  ;;  %v4175_v28 = vpop.f32.mrb[26].mxu1  ;;  %v3201_v0 = vpack.c.bf16 %v3185_v36, %v3185_v36 }
 0x354   : > { %v3111_v43 = vrot.slane %v3110_v26, 1  ;;  %v3113_v19 = vmax.f32 %v3031_v10, %v3032_v18  ;;  %v3037_v35 = vadd.f32 %v4224_v23, %v6451_v63  ;;  %v2949_v24 = vpop.f32.mrb[27].mxu1  ;;  %v3200_v38 = vpack.c.bf16 %v3184_v58, %v3184_v58 }
 0x355   : > { %v3104_v44 = vrot.slane %v3103_v47, 1  ;;  %v3121_v45 = vrot.slane %v3120_v52, 4  ;;  %v3035_v39 = vadd.f32 %v4225_v50, %v6451_v63  ;;  %v3256_v34 = vunpack.c.l.b16 %v3201_v0 }
 0x356   : > { %v3112_v11 = vmax.f32 %v3110_v26, %v3111_v43  ;;  %v3114_v17 = vrot.slane %v3113_v19, 4  ;;  %v4226_v42 = vadd.f32 %v4175_v28, %v6414_v48  ;;  %v3255_v51 = vunpack.c.l.b16 %v3200_v38 }
 0x357   : > { %v3105_v33 = vmax.f32 %v3103_v47, %v3104_v44  ;;  %v3122_v60 = vmax.f32 %v3120_v52, %v3121_v45  ;;  %v4227_v55 = vadd.f32 %v2949_v24, %v6416_v6  ;;  %v3283_v31 = vrot.slane %v3256_v34, 1 }
 0x358   : > { %v3171_v57 = vadd.f32 %v6477_v40, %v3112_v11  ;;  %v3115_v12 = vmax.f32 %v3113_v19, %v3114_v17  ;;  %v3038_v49 = vadd.f32 %v4226_v42, %v6457_v25  ;;  %v3280_v59 = vrot.slane %v3255_v51, 2 }
 0x359   : > { %v3170_v53 = vadd.f32 %v6477_v40, %v3105_v33  ;;  %v3123_v4 = vrot.slane %v3122_v60, 2  ;;  %v3036_v27 = vadd.f32 %v4227_v55, %v6457_v25  ;;  %v4178_v48 = vpop.f32.mrb[28].mxu1  ;;  %v3279_v19 = vsel %vm3278_vm6, %v6513_v1, %v6521_v46 }
 0x35a   : > { %v3187_v61 = vmax.f32 %v3171_v57, 0.0  ;;  %v3116_v30 = vrot.slane %v3115_v12, 2  ;;  %v3134_v8 = vmax.f32 %v3037_v35, %v3038_v49  ;;  %v4228_v6 = vadd.f32 %v4178_v48, %v6421_v15  ;;  %v2962_v2 = vpop.f32.mrb[29].mxu1 }
 0x35b   : > { %v3186_v20 = vmax.f32 %v3170_v53, 0.0  ;;  %v3124_v29 = vmax.f32 %v3122_v60, %v3123_v4  ;;  %v3127_v41 = vmax.f32 %v3035_v39, %v3036_v27  ;;  %v4229_v54 = vadd.f32 %v2962_v2, %v6423_v37  ;;  %v4179_v32 = vpop.f32.mrb[30].mxu1 }
 0x35c   : > { %v3203_v3 = vpack.c.bf16 %v3187_v61, %v3187_v61  ;;  %v3117_v62 = vmax.f32 %v3115_v12, %v3116_v30  ;;  %v3135_v5 = vrot.slane %v3134_v8, 4  ;;  %v3041_v10 = vadd.f32 %v4228_v6, %v6451_v63  ;;  %v2965_v21 = vpop.f32.mrb[31].mxu1 }
 0x35d   : > { %v3202_v9 = vpack.c.bf16 %v3186_v20, %v3186_v20  ;;  %v3125_v22 = vrot.slane %v3124_v29, 1  ;;  %v3128_v7 = vrot.slane %v3127_v41, 4  ;;  %v3039_v13 = vadd.f32 %v4229_v54, %v6451_v63 }
 0x35e   : > { %v3258_v36 = vunpack.c.l.b16 %v3203_v3  ;;  %v3118_v15 = vrot.slane %v3117_v62, 1  ;;  %v3136_v26 = vmax.f32 %v3134_v8, %v3135_v5  ;;  %v4230_v18 = vadd.f32 %v4179_v32, %v6425_v56 }
 0x35f   : > { %v3257_v23 = vunpack.c.l.b16 %v3202_v9  ;;  %v3126_v14 = vmax.f32 %v3124_v29, %v3125_v22  ;;  %v3129_v37 = vmax.f32 %v3127_v41, %v3128_v7  ;;  %v4231_v58 = vadd.f32 %v2965_v21, %v6427_v16 }
 0x360   : > { %v3286_v47 = vrot.slane %v3258_v36, 7  ;;  %v3119_v52 = vmax.f32 %v3117_v62, %v3118_v15  ;;  %v3137_v50 = vrot.slane %v3136_v26, 2  ;;  %v3042_v28 = vadd.f32 %v4230_v18, %v6457_v25 }
 0x361   : > { %v3173_v0 = vadd.f32 %v6477_v40, %v3126_v14  ;;  %v3130_v43 = vrot.slane %v3129_v37, 2  ;;  %v3040_v63 = vadd.f32 %v4231_v58, %v6457_v25  ;;  %v3282_v39 = vsel %vm3281_vm7, %v3280_v59, %v3279_v19 }
 0x362   : > { %v3287_v56 = vsel %vm3266_vm2, %v3286_v47, %v3257_v23  ;;  %v3172_v35 = vadd.f32 %v6477_v40, %v3119_v52  ;;  %v3138_v24 = vmax.f32 %v3136_v26, %v3137_v50  ;;  %v3148_v16 = vmax.f32 %v3041_v10, %v3042_v28  ;;  %v3724_v28 = vld [vmem:[%s6621_s6] ss:$0 sm:$0xff] }
 0x363   : > { %v3189_v38 = vmax.f32 %v3173_v0, 0.0  ;;  %v3131_v44 = vmax.f32 %v3129_v37, %v3130_v43  ;;  %v3141_v45 = vmax.f32 %v3039_v13, %v3040_v63  ;;  %v3285_v25 = vsel %vm3284_vm8, %v3283_v31, %v3282_v39 }
 0x364   : > { %v3188_v34 = vmax.f32 %v3172_v35, 0.0  ;;  %v3139_v11 = vrot.slane %v3138_v24, 1  ;;  %v3149_v17 = vrot.slane %v3148_v16, 4 }
 0x365   : > { %v3205_v42 = vpack.c.bf16 %v3189_v38, %v3189_v38  ;;  %v3132_v51 = vrot.slane %v3131_v44, 1  ;;  %v3142_v33 = vrot.slane %v3141_v45, 4 }
 0x366   : > { %v3204_v1 = vpack.c.bf16 %v3188_v34, %v3188_v34  ;;  %v3140_v46 = vmax.f32 %v3138_v24, %v3139_v11  ;;  %v3150_v60 = vmax.f32 %v3148_v16, %v3149_v17 }
 0x367   : > { %v3260_v55 = vunpack.c.l.b16 %v3205_v42  ;;  %v3133_v57 = vmax.f32 %v3131_v44, %v3132_v51  ;;  %v3143_v12 = vmax.f32 %v3141_v45, %v3142_v33 }
 0x368   : > { %v3259_v49 = vunpack.c.l.b16 %v3204_v1  ;;  %v3175_v53 = vadd.f32 %v6477_v40, %v3140_v46  ;;  %v3151_v4 = vrot.slane %v3150_v60, 2 }
 0x369   : > { %v3174_v59 = vadd.f32 %v6477_v40, %v3133_v57  ;;  %v3144_v27 = vrot.slane %v3143_v12, 2  ;;  %v3290_v31 = vrot.slane %v3260_v55, 5 }
 0x36a   : > { %v3288_v48 = vrot.slane %v3259_v49, 6  ;;  %v3191_v61 = vmax.f32 %v3175_v53, 0.0  ;;  %v3152_v30 = vmax.f32 %v3150_v60, %v3151_v4 }
 0x36b   : > { %v3190_v8 = vmax.f32 %v3174_v59, 0.0  ;;  %v3145_v6 = vmax.f32 %v3143_v12, %v3144_v27 }
 0x36c   : > { %v3289_v2 = vsel %vm3269_vm3, %v3288_v48, %v3287_v56  ;;  %v3207_v20 = vpack.c.bf16 %v3191_v61, %v3191_v61  ;;  %v3153_v29 = vrot.slane %v3152_v30, 1 }
 0x36d   : > { %v3206_v41 = vpack.c.bf16 %v3190_v8, %v3190_v8  ;;  %v3291_v54 = vsel %vm3272_vm4, %v3290_v31, %v3289_v2  ;;  %v3146_v32 = vrot.slane %v3145_v6, 1 }
 0x36e   : > { %v3262_v3 = vunpack.c.l.b16 %v3207_v20  ;;  %v3154_v62 = vmax.f32 %v3152_v30, %v3153_v29 }
 0x36f   : > { %v3261_v5 = vunpack.c.l.b16 %v3206_v41  ;;  %v3147_v10 = vmax.f32 %v3145_v6, %v3146_v32 }
 0x370   : > { %v3177_v21 = vadd.f32 %v6477_v40, %v3154_v62  ;;  %v3294_v7 = vrot.slane %v3262_v3, 3 }
 0x371   : > { %v3292_v9 = vrot.slane %v3261_v5, 4  ;;  %v3176_v22 = vadd.f32 %v6477_v40, %v3147_v10 }
 0x372   : > { %v3193_v13 = vmax.f32 %v3177_v21, 0.0 }
 0x373   : > { %v3293_v36 = vsel %vm3275_vm5, %v3292_v9, %v3291_v54  ;;  %v3192_v15 = vmax.f32 %v3176_v22, 0.0 }
 0x374   : > { %v3209_v26 = vpack.c.bf16 %v3193_v13, %v3193_v13  ;;  %v3295_v18 = vsel %vm3278_vm6, %v3294_v7, %v3293_v36 }
 0x375   : > { %v3208_v23 = vpack.c.bf16 %v3192_v15, %v3192_v15 }
 0x376   : > { %v3264_v14 = vunpack.c.l.b16 %v3209_v26 }
 0x377   : > { %v3263_v37 = vunpack.c.l.b16 %v3208_v23 }
 0x378   : > { %v3298_v47 = vrot.slane %v3264_v14, 1 }
 0x379   : > { %v3296_v58 = vrot.slane %v3263_v37, 2 }
 0x37b   : > { %v3297_v52 = vsel %vm3281_vm7, %v3296_v58, %v3295_v18 }
 0x37c   : > { %v3299_v50 = vsel %vm3284_vm8, %v3298_v47, %v3297_v52 }
 0x37d   : > { %v3300_v40 = vpack.c.b16 %v3299_v50, %v3285_v25 }
 0x37f   : > { %4197 = vmatmul.mubr.bf16.vlgmr.msra.gmra.mrb[80].mxu0 %v3300_v40 }
 0x452   : > { %v3384_v0 = vpop.f32.mrb[80].mxu0 }
 0x453   : > { %v3385_v43 = vadd.f32 %v3724_v28, %v3384_v0  ;;  %v4198_v63 = vpop.f32.mrb[81].mxu0 }
 0x454   : > { %v3387_v19 = vpop.f32.mrb[82].mxu0 }
 0x455   : > { %3391 = vst [vmem:[%s272_s13] sm:$0xff] %v3385_v43  ;;  %v3388_v56 = vadd.f32 %v3724_v28, %v3387_v19  ;;  %v4199_v35 = vpop.f32.mrb[83].mxu0 }
 0x457   : > { %3392 = vst [vmem:[%s272_s13 + $0x8] sm:$0xff] %v3388_v56 }
 0x458   : > { %4404 = shalt.err (!%p4401_p3)
}
 0x459   : > { %s4405_s22 = scalar_lea.hbm %s6572_s17, 256  ;;  %s4409_s9 = scalar_lea.hbm %s6622_s7, 512 }
 0x45a   : > { %p4406_p4 = scmp.ne.s32.totalorder %s6572_s17, %s4405_s22  ;;  %p4410_p9 = scmp.lt.u32.totalorder %s6572_s17, %s6622_s7 }
 0x45b   : > { %p4411_p10 = scmp.lt.u32.totalorder %s4409_s9, %s4405_s22  ;;  %p4413_p12 = scmp.lt.u32.totalorder %s4405_s22, %s6572_s17 }
 0x45c   : > { %p4407_p7 = pnand %p4406_p4, %p4540_p5 }
 0x45d   : > { %p4412_p11 = por %p4411_p10, %p4410_p9 }
 0x45e   : > { %p4408_p8 = pneg %p4407_p7 }
 0x45f   : > { %p4414_p13 = por %p4413_p12, %p4412_p11 }
 0x461   : > { %p4415_p0 = pnand %p4414_p13, %p4408_p8 }
 0x463   : > { %4418 = shalt.err (!%p4415_p0)
}
 0x464   : > { %s4460_s15 = smov 128   ;;  %s4461_s16 = smov 8  }
 0x465   : > { %4296 = dma.vmem_to_hbm [thread:$0]  (%p4540_p5), %s6567_s23, 256, %s6572_s17, %s6574_s18, %s4460_s15, %s4460_s15, %s4461_s16  }
 0x466 PF: > { %p4302_p1 = scmp.ge.s32.totalorder %s4453_s27, 2  ;;  %s3422_s28 = sand.u32 1, %s4441_s24  }
 0x467   : > { %s3423_s19 = scalar_lea.sflag [#allocation3], %s3422_s28 }
 0x468   : > { %p4299_p2 = pnand %p4302_p1, %p4544_p6 }
 0x46a   : > { %4436 = dma.done.wait (!%p4299_p2), %s3423_s19, 256  }
 0x46b   : > { %4438 = vsyncadd (!%p4299_p2), %s3423_s19, 4294967040  ;;  %p17_p3 = scmp.ge.s32.totalorder %s4527_s30, 4   ;;  %s7018_s24 = smov %s4445_s25 }
 0x46c   : > { %s7019_s25 = smov %s4449_s26  ;;  %s7020_s26 = smov %s4538_s10 }
 0x46d   : > { %s7021_s27 = smov %s4527_s30  ;;  %19 = sbr.rel (!%p17_p3) target bundleno = 3 (0x3), region = 83 }
 0x474   :  { %3428 = vsyncpa [#allocation3], 1 }
 0x475   :  { %3430 = vsyncpa [#allocation3 + $0x1], 1 }

</bundles_post_ra>
